<compile_context>
chip_gen: v7x
topology: tpu7x:2x2x1
jax: 0.10.0
libtpu: 0.0.40
codegen_flags: <defaults>
</compile_context>

<pallas_src>
import functools

import jax
import jax.numpy as jnp
from jax.experimental import pallas as pl
from jax.experimental.pallas import tpu as pltpu

KSIZE = 3
POW = 0.9999


def _subhom_kernel(x_ref, z_ref, w1_ref, b1_ref, w2_ref, out_ref, *,
                   pow_, cin, cout, height, width):
    # x_ref:  (1, Cin,  H*W)      input injection, one sample, lanes = H*W
    # z_ref:  (1, Cout, H*W)      current iterate, one sample
    # w1_ref: (9, Cin,  Cout, 1)  conv1 weights as per-tap column vectors (VMEM)
    # b1_ref: (Cout, 1)           conv1 bias column (VMEM)
    # w2_ref: (9, Cout, Cout, 1)  conv2 weights (VMEM)
    # out_ref:(1, Cout, H*W)
    hw = height * width

    x = x_ref[0].astype(jnp.float32)    # (Cin,  HW)
    z = z_ref[0].astype(jnp.float32)    # (Cout, HW)

    # Lane-index helpers for the 1-pixel "same"-padding border masks.
    lane = jax.lax.broadcasted_iota(jnp.int32, (1, hw), 1)   # flat index h*W+w
    col = lane % width                                       # w coordinate

    acc1 = jnp.zeros((cout, hw), jnp.float32)    # conv1(x)
    acc2 = jnp.zeros((cout, hw), jnp.float32)    # conv2(z)

    for kh in range(KSIZE):
        dh = kh - 1
        for kw_ in range(KSIZE):
            dw = kw_ - 1
            off = dh * width + dw
            t = kh * KSIZE + kw_

            if off == 0:
                sx, sz = x, z                    # center tap: no shift, no mask
            else:
                shift = (-off) % hw              # out[i] = in[i + off]
                sx = pltpu.roll(x, shift=shift, axis=1)
                sz = pltpu.roll(z, shift=shift, axis=1)
                conds = []
                if dh < 0:
                    conds.append(lane >= (-dh) * width)            # h+dh >= 0
                elif dh > 0:
                    conds.append(lane < (height - dh) * width)     # h+dh < H
                if dw < 0:
                    conds.append(col >= -dw)                       # w+dw >= 0
                elif dw > 0:
                    conds.append(col < width - dw)                 # w+dw < W
                mask = conds[0]
                for c in conds[1:]:
                    mask = jnp.logical_and(mask, c)
                sx = jnp.where(mask, sx, 0.0)    # (1,HW) mask broadcasts rows
                sz = jnp.where(mask, sz, 0.0)

            # Channel mixing: (Cout,1) weight column * (1,HW) shifted row
            # -> lane-dense (Cout,HW) broadcast FMA on the VPU.
            for ci in range(cin):
                acc1 = acc1 + w1_ref[t, ci] * sx[ci:ci + 1, :]
            for ci in range(cout):
                acc2 = acc2 + w2_ref[t, ci] * sz[ci:ci + 1, :]

    # Fused epilogue: relu(conv1 + b1) + (tanh(conv2) + 1.01) ** pow
    y = jnp.maximum(acc1 + b1_ref[...], 0.0)
    base = jnp.tanh(acc2) + jnp.float32(1.01)            # always > 0
    if abs(pow_ - 1.0) < 1.5e-3:                         # pow = 0.9999 here
        # base**p = base * exp((p-1) ln base); 2nd-order expansion of exp.
        tlog = jnp.float32(pow_ - 1.0) * jnp.log(base)
        powed = base * (1.0 + tlog * (1.0 + 0.5 * tlog))
    else:
        powed = jnp.exp(jnp.float32(pow_) * jnp.log(base))
    out_ref[0] = (powed + y).astype(out_ref.dtype)


def subhom_forward(z_nchw, x_nchw, w1, b1, w2, pow_=POW):
    """Forward pass matching Subhomlayer_power_scal_tanh with norm=None.

    z_nchw: (N, C, H, W)    current iterate
    x_nchw: (N, Cin, H, W)  input injection
    w1:     (C, Cin, 3, 3)  conv1 weight (PyTorch OIHW layout)
    b1:     (C,)            conv1 bias
    w2:     (C, C, 3, 3)    conv2 weight (no bias)
    returns (N, C, H, W)
    """
    N, Cin, H, W = x_nchw.shape
    Cout = w1.shape[0]
    HW = H * W

    # Free adjacent-dim-merge reshapes: lane axis = H*W, no extra HBM pass.
    x_flat = x_nchw.reshape(N, Cin, HW)
    z_flat = z_nchw.reshape(N, Cout, HW)

    # Tiny weight tables, pre-transposed so the kernel reads (Cout,1) columns:
    #   w1_col[t, ci, co, 0] = w1[co, ci, kh, kw],  t = kh*3 + kw
    w1_col = jnp.transpose(
        w1.reshape(Cout, Cin, KSIZE * KSIZE).astype(jnp.float32),
        (2, 1, 0)).reshape(KSIZE * KSIZE, Cin, Cout, 1)
    w2_col = jnp.transpose(
        w2.reshape(Cout, Cout, KSIZE * KSIZE).astype(jnp.float32),
        (2, 1, 0)).reshape(KSIZE * KSIZE, Cout, Cout, 1)
    b1_col = b1.reshape(Cout, 1).astype(jnp.float32)

    kernel = functools.partial(_subhom_kernel, pow_=float(pow_),
                               cin=Cin, cout=Cout, height=H, width=W)

    out = pl.pallas_call(
        kernel,
        out_shape=jax.ShapeDtypeStruct((N, Cout, HW), jnp.float32),
        grid_spec=pltpu.PrefetchScalarGridSpec(
            num_scalar_prefetch=0,
            grid=(N,),
            in_specs=[
                pl.BlockSpec((1, Cin, HW), lambda n: (n, 0, 0)),            # x
                pl.BlockSpec((1, Cout, HW), lambda n: (n, 0, 0)),           # z
                pl.BlockSpec((KSIZE * KSIZE, Cin, Cout, 1),
                             lambda n: (0, 0, 0, 0)),                       # w1
                pl.BlockSpec((Cout, 1), lambda n: (0, 0)),                  # b1
                pl.BlockSpec((KSIZE * KSIZE, Cout, Cout, 1),
                             lambda n: (0, 0, 0, 0)),                       # w2
            ],
            out_specs=pl.BlockSpec((1, Cout, HW), lambda n: (n, 0, 0)),
        ),
        compiler_params=pltpu.CompilerParams(
            dimension_semantics=("parallel",),
        ),
    )(x_flat, z_flat, w1_col, b1_col, w2_col)

    return out.reshape(N, Cout, H, W)   # free split of the last dim


def _reference_forward(z_nchw, x_nchw, w1, b1, w2, pow_=POW):
    """Pure-JAX reference using lax.conv (NCHW) for correctness checking."""
    dn = jax.lax.conv_dimension_numbers(x_nchw.shape, w1.shape,
                                        ("NCHW", "OIHW", "NCHW"))
    c1 = jax.lax.conv_general_dilated(x_nchw, w1, (1, 1), "SAME",
                                      dimension_numbers=dn)
    c1 = c1 + b1.reshape(1, -1, 1, 1)
    y = jnp.maximum(c1, 0.0)
    dn2 = jax.lax.conv_dimension_numbers(z_nchw.shape, w2.shape,
                                         ("NCHW", "OIHW", "NCHW"))
    c2 = jax.lax.conv_general_dilated(z_nchw, w2, (1, 1), "SAME",
                                      dimension_numbers=dn2)
    return jnp.power(jnp.tanh(c2) + 1.01, pow_) + y


if __name__ == "__main__":
    # Module config (synthetic, deterministic): n_channels = n_inner_channels = 4
    N, C, H, W = 2, 4, 16, 16
    key = jax.random.PRNGKey(0)
    kx, kz, kw1, kb1, kw2 = jax.random.split(key, 5)

    x = jax.random.normal(kx, (N, C, H, W), dtype=jnp.float32)
    z = jax.random.normal(kz, (N, C, H, W), dtype=jnp.float32)

    # conv1.weight ~ N(0, 0.01) as in the module's __init__; bias & conv2 weight
    # deterministic small randoms (synthetic init, no checkpoint load).
    w1 = 0.01 * jax.random.normal(kw1, (C, C, KSIZE, KSIZE), dtype=jnp.float32)
    b1 = 0.1 * jax.random.normal(kb1, (C,), dtype=jnp.float32)
    w2 = 0.1 * jax.random.normal(kw2, (C, C, KSIZE, KSIZE), dtype=jnp.float32)

    out = jax.block_until_ready(subhom_forward(z, x, w1, b1, w2))
    ref = jax.block_until_ready(_reference_forward(z, x, w1, b1, w2))

    assert out.shape == (N, C, H, W)
    assert jnp.allclose(out, ref, atol=1e-4, rtol=1e-4), "mismatch vs reference"

    print("KERNEL_OK")
</pallas_src>

<mosaic_0001>
module attributes {stable_mosaic.version = 11 : i64} {
  func.func @_subhom_kernel(%arg0: i32, %arg1: memref<1x4x256xf32, #tpu.memory_space<vmem>>, %arg2: memref<1x4x256xf32, #tpu.memory_space<vmem>>, %arg3: memref<9x4x4x1xf32, #tpu.memory_space<vmem>>, %arg4: memref<4x1xf32, #tpu.memory_space<vmem>>, %arg5: memref<9x4x4x1xf32, #tpu.memory_space<vmem>>, %arg6: memref<1x4x256xf32, #tpu.memory_space<vmem>>) attributes {dimension_semantics = [#tpu.dimension_semantics<parallel>], iteration_bounds = array<i64: 2>, scalar_prefetch = 0 : i64, scratch_operands = 0 : i64, tpu.core_type = #tpu.core_type<tc>, window_params = [{transform_indices = @transform_0, window_bounds = array<i64: 1, 4, 256>}, {transform_indices = @transform_1, window_bounds = array<i64: 1, 4, 256>}, {pipeline_mode = #tpu.pipeline_mode<synchronous>, transform_indices = @transform_2, window_bounds = array<i64: 9, 4, 4, 1>}, {pipeline_mode = #tpu.pipeline_mode<synchronous>, transform_indices = @transform_3, window_bounds = array<i64: 4, 1>}, {pipeline_mode = #tpu.pipeline_mode<synchronous>, transform_indices = @transform_4, window_bounds = array<i64: 9, 4, 4, 1>}, {transform_indices = @transform_5, window_bounds = array<i64: 1, 4, 256>}]} {
    %c0 = arith.constant 0 : index
    %c0_0 = arith.constant 0 : index
    %c0_1 = arith.constant 0 : index
    %0 = vector.load %arg1[%c0, %c0_0, %c0_1] : memref<1x4x256xf32, #tpu.memory_space<vmem>>, vector<1x4x256xf32>
    %1 = vector.shape_cast %0 : vector<1x4x256xf32> to vector<4x256xf32>
    %c0_2 = arith.constant 0 : index
    %c0_3 = arith.constant 0 : index
    %c0_4 = arith.constant 0 : index
    %2 = vector.load %arg2[%c0_2, %c0_3, %c0_4] : memref<1x4x256xf32, #tpu.memory_space<vmem>>, vector<1x4x256xf32>
    %3 = vector.shape_cast %2 : vector<1x4x256xf32> to vector<4x256xf32>
    %4 = tpu.iota {dimensions = array<i32: 1>} : vector<1x256xi32>
    %c16_i32 = arith.constant 16 : i32
    %c0_i32 = arith.constant 0 : i32
    %5 = arith.cmpi eq, %c16_i32, %c0_i32 : i32
    %c1_i32 = arith.constant 1 : i32
    %6 = arith.select %5, %c1_i32, %c16_i32 : i32
    %7 = vector.broadcast %6 : i32 to vector<1x256xi32>
    %8 = arith.remsi %4, %7 : vector<1x256xi32>
    %c0_i32_5 = arith.constant 0 : i32
    %9 = vector.broadcast %c0_i32_5 : i32 to vector<1x256xi32>
    %10 = arith.cmpi ne, %8, %9 : vector<1x256xi32>
    %c0_i32_6 = arith.constant 0 : i32
    %11 = vector.broadcast %c0_i32_6 : i32 to vector<1x256xi32>
    %12 = arith.cmpi slt, %8, %11 : vector<1x256xi32>
    %c0_i32_7 = arith.constant 0 : i32
    %13 = arith.cmpi slt, %6, %c0_i32_7 : i32
    %14 = vector.broadcast %13 : i1 to vector<1x256xi1>
    %15 = vector.broadcast %14 : vector<1x256xi1> to vector<1x256xi1>
    %16 = arith.xori %12, %15 : vector<1x256xi1>
    %17 = arith.andi %16, %10 : vector<1x256xi1>
    %18 = vector.broadcast %6 : i32 to vector<1x256xi32>
    %19 = arith.addi %8, %18 : vector<1x256xi32>
    %20 = arith.select %17, %19, %8 : vector<1x256xi1>, vector<1x256xi32>
    %cst = arith.constant 0.000000e+00 : f32
    %21 = vector.broadcast %cst : f32 to vector<4x256xf32>
    %cst_8 = arith.constant 0.000000e+00 : f32
    %22 = vector.broadcast %cst_8 : f32 to vector<4x256xf32>
    %c17_i32 = arith.constant 17 : i32
    %23 = tpu.dynamic_rotate %1 by %c17_i32 dim 1 : vector<4x256xf32>, i32 -> vector<4x256xf32>
    %c17_i32_9 = arith.constant 17 : i32
    %24 = tpu.dynamic_rotate %3 by %c17_i32_9 dim 1 : vector<4x256xf32>, i32 -> vector<4x256xf32>
    %c16_i32_10 = arith.constant 16 : i32
    %25 = vector.broadcast %c16_i32_10 : i32 to vector<1x256xi32>
    %26 = arith.cmpi sge, %4, %25 : vector<1x256xi32>
    %c1_i32_11 = arith.constant 1 : i32
    %27 = vector.broadcast %c1_i32_11 : i32 to vector<1x256xi32>
    %28 = arith.cmpi sge, %20, %27 : vector<1x256xi32>
    %29 = arith.andi %26, %28 : vector<1x256xi1>
    %cst_12 = arith.constant 0.000000e+00 : f32
    %30 = vector.shape_cast %29 : vector<1x256xi1> to vector<1x256xi1>
    %31 = vector.broadcast %30 : vector<1x256xi1> to vector<4x256xi1>
    %32 = vector.broadcast %cst_12 : f32 to vector<4x256xf32>
    %33 = arith.select %31, %23, %32 : vector<4x256xi1>, vector<4x256xf32>
    %cst_13 = arith.constant 0.000000e+00 : f32
    %34 = vector.shape_cast %29 : vector<1x256xi1> to vector<1x256xi1>
    %35 = vector.broadcast %34 : vector<1x256xi1> to vector<4x256xi1>
    %36 = vector.broadcast %cst_13 : f32 to vector<4x256xf32>
    %37 = arith.select %35, %24, %36 : vector<4x256xi1>, vector<4x256xf32>
    %c0_14 = arith.constant 0 : index
    %c0_15 = arith.constant 0 : index
    %c0_16 = arith.constant 0 : index
    %c0_17 = arith.constant 0 : index
    %38 = vector.load %arg3[%c0_14, %c0_15, %c0_16, %c0_17] : memref<9x4x4x1xf32, #tpu.memory_space<vmem>>, vector<1x1x4x1xf32>
    %39 = vector.shape_cast %38 : vector<1x1x4x1xf32> to vector<4x1xf32>
    %40 = vector.extract_strided_slice %33 {offsets = [0, 0], sizes = [1, 256], strides = [1, 1]} : vector<4x256xf32> to vector<1x256xf32>
    %41 = vector.broadcast %39 : vector<4x1xf32> to vector<4x256xf32>
    %42 = vector.broadcast %40 : vector<1x256xf32> to vector<4x256xf32>
    %43 = arith.mulf %41, %42 : vector<4x256xf32>
    %44 = arith.addf %21, %43 : vector<4x256xf32>
    %c0_18 = arith.constant 0 : index
    %c1 = arith.constant 1 : index
    %c0_19 = arith.constant 0 : index
    %c0_20 = arith.constant 0 : index
    %45 = vector.load %arg3[%c0_18, %c1, %c0_19, %c0_20] : memref<9x4x4x1xf32, #tpu.memory_space<vmem>>, vector<1x1x4x1xf32>
    %46 = vector.shape_cast %45 : vector<1x1x4x1xf32> to vector<4x1xf32>
    %47 = vector.extract_strided_slice %33 {offsets = [1, 0], sizes = [1, 256], strides = [1, 1]} : vector<4x256xf32> to vector<1x256xf32>
    %48 = vector.broadcast %46 : vector<4x1xf32> to vector<4x256xf32>
    %49 = vector.broadcast %47 : vector<1x256xf32> to vector<4x256xf32>
    %50 = arith.mulf %48, %49 : vector<4x256xf32>
    %51 = arith.addf %44, %50 : vector<4x256xf32>
    %c0_21 = arith.constant 0 : index
    %c2 = arith.constant 2 : index
    %c0_22 = arith.constant 0 : index
    %c0_23 = arith.constant 0 : index
    %52 = vector.load %arg3[%c0_21, %c2, %c0_22, %c0_23] : memref<9x4x4x1xf32, #tpu.memory_space<vmem>>, vector<1x1x4x1xf32>
    %53 = vector.shape_cast %52 : vector<1x1x4x1xf32> to vector<4x1xf32>
    %54 = vector.extract_strided_slice %33 {offsets = [2, 0], sizes = [1, 256], strides = [1, 1]} : vector<4x256xf32> to vector<1x256xf32>
    %55 = vector.broadcast %53 : vector<4x1xf32> to vector<4x256xf32>
    %56 = vector.broadcast %54 : vector<1x256xf32> to vector<4x256xf32>
    %57 = arith.mulf %55, %56 : vector<4x256xf32>
    %58 = arith.addf %51, %57 : vector<4x256xf32>
    %c0_24 = arith.constant 0 : index
    %c3 = arith.constant 3 : index
    %c0_25 = arith.constant 0 : index
    %c0_26 = arith.constant 0 : index
    %59 = vector.load %arg3[%c0_24, %c3, %c0_25, %c0_26] : memref<9x4x4x1xf32, #tpu.memory_space<vmem>>, vector<1x1x4x1xf32>
    %60 = vector.shape_cast %59 : vector<1x1x4x1xf32> to vector<4x1xf32>
    %61 = vector.extract_strided_slice %33 {offsets = [3, 0], sizes = [1, 256], strides = [1, 1]} : vector<4x256xf32> to vector<1x256xf32>
    %62 = vector.broadcast %60 : vector<4x1xf32> to vector<4x256xf32>
    %63 = vector.broadcast %61 : vector<1x256xf32> to vector<4x256xf32>
    %64 = arith.mulf %62, %63 : vector<4x256xf32>
    %65 = arith.addf %58, %64 : vector<4x256xf32>
    %c0_27 = arith.constant 0 : index
    %c0_28 = arith.constant 0 : index
    %c0_29 = arith.constant 0 : index
    %c0_30 = arith.constant 0 : index
    %66 = vector.load %arg5[%c0_27, %c0_28, %c0_29, %c0_30] : memref<9x4x4x1xf32, #tpu.memory_space<vmem>>, vector<1x1x4x1xf32>
    %67 = vector.shape_cast %66 : vector<1x1x4x1xf32> to vector<4x1xf32>
    %68 = vector.extract_strided_slice %37 {offsets = [0, 0], sizes = [1, 256], strides = [1, 1]} : vector<4x256xf32> to vector<1x256xf32>
    %69 = vector.broadcast %67 : vector<4x1xf32> to vector<4x256xf32>
    %70 = vector.broadcast %68 : vector<1x256xf32> to vector<4x256xf32>
    %71 = arith.mulf %69, %70 : vector<4x256xf32>
    %72 = arith.addf %22, %71 : vector<4x256xf32>
    %c0_31 = arith.constant 0 : index
    %c1_32 = arith.constant 1 : index
    %c0_33 = arith.constant 0 : index
    %c0_34 = arith.constant 0 : index
    %73 = vector.load %arg5[%c0_31, %c1_32, %c0_33, %c0_34] : memref<9x4x4x1xf32, #tpu.memory_space<vmem>>, vector<1x1x4x1xf32>
    %74 = vector.shape_cast %73 : vector<1x1x4x1xf32> to vector<4x1xf32>
    %75 = vector.extract_strided_slice %37 {offsets = [1, 0], sizes = [1, 256], strides = [1, 1]} : vector<4x256xf32> to vector<1x256xf32>
    %76 = vector.broadcast %74 : vector<4x1xf32> to vector<4x256xf32>
    %77 = vector.broadcast %75 : vector<1x256xf32> to vector<4x256xf32>
    %78 = arith.mulf %76, %77 : vector<4x256xf32>
    %79 = arith.addf %72, %78 : vector<4x256xf32>
    %c0_35 = arith.constant 0 : index
    %c2_36 = arith.constant 2 : index
    %c0_37 = arith.constant 0 : index
    %c0_38 = arith.constant 0 : index
    %80 = vector.load %arg5[%c0_35, %c2_36, %c0_37, %c0_38] : memref<9x4x4x1xf32, #tpu.memory_space<vmem>>, vector<1x1x4x1xf32>
    %81 = vector.shape_cast %80 : vector<1x1x4x1xf32> to vector<4x1xf32>
    %82 = vector.extract_strided_slice %37 {offsets = [2, 0], sizes = [1, 256], strides = [1, 1]} : vector<4x256xf32> to vector<1x256xf32>
    %83 = vector.broadcast %81 : vector<4x1xf32> to vector<4x256xf32>
    %84 = vector.broadcast %82 : vector<1x256xf32> to vector<4x256xf32>
    %85 = arith.mulf %83, %84 : vector<4x256xf32>
    %86 = arith.addf %79, %85 : vector<4x256xf32>
    %c0_39 = arith.constant 0 : index
    %c3_40 = arith.constant 3 : index
    %c0_41 = arith.constant 0 : index
    %c0_42 = arith.constant 0 : index
    %87 = vector.load %arg5[%c0_39, %c3_40, %c0_41, %c0_42] : memref<9x4x4x1xf32, #tpu.memory_space<vmem>>, vector<1x1x4x1xf32>
    %88 = vector.shape_cast %87 : vector<1x1x4x1xf32> to vector<4x1xf32>
    %89 = vector.extract_strided_slice %37 {offsets = [3, 0], sizes = [1, 256], strides = [1, 1]} : vector<4x256xf32> to vector<1x256xf32>
    %90 = vector.broadcast %88 : vector<4x1xf32> to vector<4x256xf32>
    %91 = vector.broadcast %89 : vector<1x256xf32> to vector<4x256xf32>
    %92 = arith.mulf %90, %91 : vector<4x256xf32>
    %93 = arith.addf %86, %92 : vector<4x256xf32>
    %c16_i32_43 = arith.constant 16 : i32
    %94 = tpu.dynamic_rotate %1 by %c16_i32_43 dim 1 : vector<4x256xf32>, i32 -> vector<4x256xf32>
    %c16_i32_44 = arith.constant 16 : i32
    %95 = tpu.dynamic_rotate %3 by %c16_i32_44 dim 1 : vector<4x256xf32>, i32 -> vector<4x256xf32>
    %c16_i32_45 = arith.constant 16 : i32
    %96 = vector.broadcast %c16_i32_45 : i32 to vector<1x256xi32>
    %97 = arith.cmpi sge, %4, %96 : vector<1x256xi32>
    %cst_46 = arith.constant 0.000000e+00 : f32
    %98 = vector.shape_cast %97 : vector<1x256xi1> to vector<1x256xi1>
    %99 = vector.broadcast %98 : vector<1x256xi1> to vector<4x256xi1>
    %100 = vector.broadcast %cst_46 : f32 to vector<4x256xf32>
    %101 = arith.select %99, %94, %100 : vector<4x256xi1>, vector<4x256xf32>
    %cst_47 = arith.constant 0.000000e+00 : f32
    %102 = vector.shape_cast %97 : vector<1x256xi1> to vector<1x256xi1>
    %103 = vector.broadcast %102 : vector<1x256xi1> to vector<4x256xi1>
    %104 = vector.broadcast %cst_47 : f32 to vector<4x256xf32>
    %105 = arith.select %103, %95, %104 : vector<4x256xi1>, vector<4x256xf32>
    %c1_48 = arith.constant 1 : index
    %c0_49 = arith.constant 0 : index
    %c0_50 = arith.constant 0 : index
    %c0_51 = arith.constant 0 : index
    %106 = vector.load %arg3[%c1_48, %c0_49, %c0_50, %c0_51] : memref<9x4x4x1xf32, #tpu.memory_space<vmem>>, vector<1x1x4x1xf32>
    %107 = vector.shape_cast %106 : vector<1x1x4x1xf32> to vector<4x1xf32>
    %108 = vector.extract_strided_slice %101 {offsets = [0, 0], sizes = [1, 256], strides = [1, 1]} : vector<4x256xf32> to vector<1x256xf32>
    %109 = vector.broadcast %107 : vector<4x1xf32> to vector<4x256xf32>
    %110 = vector.broadcast %108 : vector<1x256xf32> to vector<4x256xf32>
    %111 = arith.mulf %109, %110 : vector<4x256xf32>
    %112 = arith.addf %65, %111 : vector<4x256xf32>
    %c1_52 = arith.constant 1 : index
    %c1_53 = arith.constant 1 : index
    %c0_54 = arith.constant 0 : index
    %c0_55 = arith.constant 0 : index
    %113 = vector.load %arg3[%c1_52, %c1_53, %c0_54, %c0_55] : memref<9x4x4x1xf32, #tpu.memory_space<vmem>>, vector<1x1x4x1xf32>
    %114 = vector.shape_cast %113 : vector<1x1x4x1xf32> to vector<4x1xf32>
    %115 = vector.extract_strided_slice %101 {offsets = [1, 0], sizes = [1, 256], strides = [1, 1]} : vector<4x256xf32> to vector<1x256xf32>
    %116 = vector.broadcast %114 : vector<4x1xf32> to vector<4x256xf32>
    %117 = vector.broadcast %115 : vector<1x256xf32> to vector<4x256xf32>
    %118 = arith.mulf %116, %117 : vector<4x256xf32>
    %119 = arith.addf %112, %118 : vector<4x256xf32>
    %c1_56 = arith.constant 1 : index
    %c2_57 = arith.constant 2 : index
    %c0_58 = arith.constant 0 : index
    %c0_59 = arith.constant 0 : index
    %120 = vector.load %arg3[%c1_56, %c2_57, %c0_58, %c0_59] : memref<9x4x4x1xf32, #tpu.memory_space<vmem>>, vector<1x1x4x1xf32>
    %121 = vector.shape_cast %120 : vector<1x1x4x1xf32> to vector<4x1xf32>
    %122 = vector.extract_strided_slice %101 {offsets = [2, 0], sizes = [1, 256], strides = [1, 1]} : vector<4x256xf32> to vector<1x256xf32>
    %123 = vector.broadcast %121 : vector<4x1xf32> to vector<4x256xf32>
    %124 = vector.broadcast %122 : vector<1x256xf32> to vector<4x256xf32>
    %125 = arith.mulf %123, %124 : vector<4x256xf32>
    %126 = arith.addf %119, %125 : vector<4x256xf32>
    %c1_60 = arith.constant 1 : index
    %c3_61 = arith.constant 3 : index
    %c0_62 = arith.constant 0 : index
    %c0_63 = arith.constant 0 : index
    %127 = vector.load %arg3[%c1_60, %c3_61, %c0_62, %c0_63] : memref<9x4x4x1xf32, #tpu.memory_space<vmem>>, vector<1x1x4x1xf32>
    %128 = vector.shape_cast %127 : vector<1x1x4x1xf32> to vector<4x1xf32>
    %129 = vector.extract_strided_slice %101 {offsets = [3, 0], sizes = [1, 256], strides = [1, 1]} : vector<4x256xf32> to vector<1x256xf32>
    %130 = vector.broadcast %128 : vector<4x1xf32> to vector<4x256xf32>
    %131 = vector.broadcast %129 : vector<1x256xf32> to vector<4x256xf32>
    %132 = arith.mulf %130, %131 : vector<4x256xf32>
    %133 = arith.addf %126, %132 : vector<4x256xf32>
    %c1_64 = arith.constant 1 : index
    %c0_65 = arith.constant 0 : index
    %c0_66 = arith.constant 0 : index
    %c0_67 = arith.constant 0 : index
    %134 = vector.load %arg5[%c1_64, %c0_65, %c0_66, %c0_67] : memref<9x4x4x1xf32, #tpu.memory_space<vmem>>, vector<1x1x4x1xf32>
    %135 = vector.shape_cast %134 : vector<1x1x4x1xf32> to vector<4x1xf32>
    %136 = vector.extract_strided_slice %105 {offsets = [0, 0], sizes = [1, 256], strides = [1, 1]} : vector<4x256xf32> to vector<1x256xf32>
    %137 = vector.broadcast %135 : vector<4x1xf32> to vector<4x256xf32>
    %138 = vector.broadcast %136 : vector<1x256xf32> to vector<4x256xf32>
    %139 = arith.mulf %137, %138 : vector<4x256xf32>
    %140 = arith.addf %93, %139 : vector<4x256xf32>
    %c1_68 = arith.constant 1 : index
    %c1_69 = arith.constant 1 : index
    %c0_70 = arith.constant 0 : index
    %c0_71 = arith.constant 0 : index
    %141 = vector.load %arg5[%c1_68, %c1_69, %c0_70, %c0_71] : memref<9x4x4x1xf32, #tpu.memory_space<vmem>>, vector<1x1x4x1xf32>
    %142 = vector.shape_cast %141 : vector<1x1x4x1xf32> to vector<4x1xf32>
    %143 = vector.extract_strided_slice %105 {offsets = [1, 0], sizes = [1, 256], strides = [1, 1]} : vector<4x256xf32> to vector<1x256xf32>
    %144 = vector.broadcast %142 : vector<4x1xf32> to vector<4x256xf32>
    %145 = vector.broadcast %143 : vector<1x256xf32> to vector<4x256xf32>
    %146 = arith.mulf %144, %145 : vector<4x256xf32>
    %147 = arith.addf %140, %146 : vector<4x256xf32>
    %c1_72 = arith.constant 1 : index
    %c2_73 = arith.constant 2 : index
    %c0_74 = arith.constant 0 : index
    %c0_75 = arith.constant 0 : index
    %148 = vector.load %arg5[%c1_72, %c2_73, %c0_74, %c0_75] : memref<9x4x4x1xf32, #tpu.memory_space<vmem>>, vector<1x1x4x1xf32>
    %149 = vector.shape_cast %148 : vector<1x1x4x1xf32> to vector<4x1xf32>
    %150 = vector.extract_strided_slice %105 {offsets = [2, 0], sizes = [1, 256], strides = [1, 1]} : vector<4x256xf32> to vector<1x256xf32>
    %151 = vector.broadcast %149 : vector<4x1xf32> to vector<4x256xf32>
    %152 = vector.broadcast %150 : vector<1x256xf32> to vector<4x256xf32>
    %153 = arith.mulf %151, %152 : vector<4x256xf32>
    %154 = arith.addf %147, %153 : vector<4x256xf32>
    %c1_76 = arith.constant 1 : index
    %c3_77 = arith.constant 3 : index
    %c0_78 = arith.constant 0 : index
    %c0_79 = arith.constant 0 : index
    %155 = vector.load %arg5[%c1_76, %c3_77, %c0_78, %c0_79] : memref<9x4x4x1xf32, #tpu.memory_space<vmem>>, vector<1x1x4x1xf32>
    %156 = vector.shape_cast %155 : vector<1x1x4x1xf32> to vector<4x1xf32>
    %157 = vector.extract_strided_slice %105 {offsets = [3, 0], sizes = [1, 256], strides = [1, 1]} : vector<4x256xf32> to vector<1x256xf32>
    %158 = vector.broadcast %156 : vector<4x1xf32> to vector<4x256xf32>
    %159 = vector.broadcast %157 : vector<1x256xf32> to vector<4x256xf32>
    %160 = arith.mulf %158, %159 : vector<4x256xf32>
    %161 = arith.addf %154, %160 : vector<4x256xf32>
    %c15_i32 = arith.constant 15 : i32
    %162 = tpu.dynamic_rotate %1 by %c15_i32 dim 1 : vector<4x256xf32>, i32 -> vector<4x256xf32>
    %c15_i32_80 = arith.constant 15 : i32
    %163 = tpu.dynamic_rotate %3 by %c15_i32_80 dim 1 : vector<4x256xf32>, i32 -> vector<4x256xf32>
    %c16_i32_81 = arith.constant 16 : i32
    %164 = vector.broadcast %c16_i32_81 : i32 to vector<1x256xi32>
    %165 = arith.cmpi sge, %4, %164 : vector<1x256xi32>
    %c15_i32_82 = arith.constant 15 : i32
    %166 = vector.broadcast %c15_i32_82 : i32 to vector<1x256xi32>
    %167 = arith.cmpi slt, %20, %166 : vector<1x256xi32>
    %168 = arith.andi %165, %167 : vector<1x256xi1>
    %cst_83 = arith.constant 0.000000e+00 : f32
    %169 = vector.shape_cast %168 : vector<1x256xi1> to vector<1x256xi1>
    %170 = vector.broadcast %169 : vector<1x256xi1> to vector<4x256xi1>
    %171 = vector.broadcast %cst_83 : f32 to vector<4x256xf32>
    %172 = arith.select %170, %162, %171 : vector<4x256xi1>, vector<4x256xf32>
    %cst_84 = arith.constant 0.000000e+00 : f32
    %173 = vector.shape_cast %168 : vector<1x256xi1> to vector<1x256xi1>
    %174 = vector.broadcast %173 : vector<1x256xi1> to vector<4x256xi1>
    %175 = vector.broadcast %cst_84 : f32 to vector<4x256xf32>
    %176 = arith.select %174, %163, %175 : vector<4x256xi1>, vector<4x256xf32>
    %c2_85 = arith.constant 2 : index
    %c0_86 = arith.constant 0 : index
    %c0_87 = arith.constant 0 : index
    %c0_88 = arith.constant 0 : index
    %177 = vector.load %arg3[%c2_85, %c0_86, %c0_87, %c0_88] : memref<9x4x4x1xf32, #tpu.memory_space<vmem>>, vector<1x1x4x1xf32>
    %178 = vector.shape_cast %177 : vector<1x1x4x1xf32> to vector<4x1xf32>
    %179 = vector.extract_strided_slice %172 {offsets = [0, 0], sizes = [1, 256], strides = [1, 1]} : vector<4x256xf32> to vector<1x256xf32>
    %180 = vector.broadcast %178 : vector<4x1xf32> to vector<4x256xf32>
    %181 = vector.broadcast %179 : vector<1x256xf32> to vector<4x256xf32>
    %182 = arith.mulf %180, %181 : vector<4x256xf32>
    %183 = arith.addf %133, %182 : vector<4x256xf32>
    %c2_89 = arith.constant 2 : index
    %c1_90 = arith.constant 1 : index
    %c0_91 = arith.constant 0 : index
    %c0_92 = arith.constant 0 : index
    %184 = vector.load %arg3[%c2_89, %c1_90, %c0_91, %c0_92] : memref<9x4x4x1xf32, #tpu.memory_space<vmem>>, vector<1x1x4x1xf32>
    %185 = vector.shape_cast %184 : vector<1x1x4x1xf32> to vector<4x1xf32>
    %186 = vector.extract_strided_slice %172 {offsets = [1, 0], sizes = [1, 256], strides = [1, 1]} : vector<4x256xf32> to vector<1x256xf32>
    %187 = vector.broadcast %185 : vector<4x1xf32> to vector<4x256xf32>
    %188 = vector.broadcast %186 : vector<1x256xf32> to vector<4x256xf32>
    %189 = arith.mulf %187, %188 : vector<4x256xf32>
    %190 = arith.addf %183, %189 : vector<4x256xf32>
    %c2_93 = arith.constant 2 : index
    %c2_94 = arith.constant 2 : index
    %c0_95 = arith.constant 0 : index
    %c0_96 = arith.constant 0 : index
    %191 = vector.load %arg3[%c2_93, %c2_94, %c0_95, %c0_96] : memref<9x4x4x1xf32, #tpu.memory_space<vmem>>, vector<1x1x4x1xf32>
    %192 = vector.shape_cast %191 : vector<1x1x4x1xf32> to vector<4x1xf32>
    %193 = vector.extract_strided_slice %172 {offsets = [2, 0], sizes = [1, 256], strides = [1, 1]} : vector<4x256xf32> to vector<1x256xf32>
    %194 = vector.broadcast %192 : vector<4x1xf32> to vector<4x256xf32>
    %195 = vector.broadcast %193 : vector<1x256xf32> to vector<4x256xf32>
    %196 = arith.mulf %194, %195 : vector<4x256xf32>
    %197 = arith.addf %190, %196 : vector<4x256xf32>
    %c2_97 = arith.constant 2 : index
    %c3_98 = arith.constant 3 : index
    %c0_99 = arith.constant 0 : index
    %c0_100 = arith.constant 0 : index
    %198 = vector.load %arg3[%c2_97, %c3_98, %c0_99, %c0_100] : memref<9x4x4x1xf32, #tpu.memory_space<vmem>>, vector<1x1x4x1xf32>
    %199 = vector.shape_cast %198 : vector<1x1x4x1xf32> to vector<4x1xf32>
    %200 = vector.extract_strided_slice %172 {offsets = [3, 0], sizes = [1, 256], strides = [1, 1]} : vector<4x256xf32> to vector<1x256xf32>
    %201 = vector.broadcast %199 : vector<4x1xf32> to vector<4x256xf32>
    %202 = vector.broadcast %200 : vector<1x256xf32> to vector<4x256xf32>
    %203 = arith.mulf %201, %202 : vector<4x256xf32>
    %204 = arith.addf %197, %203 : vector<4x256xf32>
    %c2_101 = arith.constant 2 : index
    %c0_102 = arith.constant 0 : index
    %c0_103 = arith.constant 0 : index
    %c0_104 = arith.constant 0 : index
    %205 = vector.load %arg5[%c2_101, %c0_102, %c0_103, %c0_104] : memref<9x4x4x1xf32, #tpu.memory_space<vmem>>, vector<1x1x4x1xf32>
    %206 = vector.shape_cast %205 : vector<1x1x4x1xf32> to vector<4x1xf32>
    %207 = vector.extract_strided_slice %176 {offsets = [0, 0], sizes = [1, 256], strides = [1, 1]} : vector<4x256xf32> to vector<1x256xf32>
    %208 = vector.broadcast %206 : vector<4x1xf32> to vector<4x256xf32>
    %209 = vector.broadcast %207 : vector<1x256xf32> to vector<4x256xf32>
    %210 = arith.mulf %208, %209 : vector<4x256xf32>
    %211 = arith.addf %161, %210 : vector<4x256xf32>
    %c2_105 = arith.constant 2 : index
    %c1_106 = arith.constant 1 : index
    %c0_107 = arith.constant 0 : index
    %c0_108 = arith.constant 0 : index
    %212 = vector.load %arg5[%c2_105, %c1_106, %c0_107, %c0_108] : memref<9x4x4x1xf32, #tpu.memory_space<vmem>>, vector<1x1x4x1xf32>
    %213 = vector.shape_cast %212 : vector<1x1x4x1xf32> to vector<4x1xf32>
    %214 = vector.extract_strided_slice %176 {offsets = [1, 0], sizes = [1, 256], strides = [1, 1]} : vector<4x256xf32> to vector<1x256xf32>
    %215 = vector.broadcast %213 : vector<4x1xf32> to vector<4x256xf32>
    %216 = vector.broadcast %214 : vector<1x256xf32> to vector<4x256xf32>
    %217 = arith.mulf %215, %216 : vector<4x256xf32>
    %218 = arith.addf %211, %217 : vector<4x256xf32>
    %c2_109 = arith.constant 2 : index
    %c2_110 = arith.constant 2 : index
    %c0_111 = arith.constant 0 : index
    %c0_112 = arith.constant 0 : index
    %219 = vector.load %arg5[%c2_109, %c2_110, %c0_111, %c0_112] : memref<9x4x4x1xf32, #tpu.memory_space<vmem>>, vector<1x1x4x1xf32>
    %220 = vector.shape_cast %219 : vector<1x1x4x1xf32> to vector<4x1xf32>
    %221 = vector.extract_strided_slice %176 {offsets = [2, 0], sizes = [1, 256], strides = [1, 1]} : vector<4x256xf32> to vector<1x256xf32>
    %222 = vector.broadcast %220 : vector<4x1xf32> to vector<4x256xf32>
    %223 = vector.broadcast %221 : vector<1x256xf32> to vector<4x256xf32>
    %224 = arith.mulf %222, %223 : vector<4x256xf32>
    %225 = arith.addf %218, %224 : vector<4x256xf32>
    %c2_113 = arith.constant 2 : index
    %c3_114 = arith.constant 3 : index
    %c0_115 = arith.constant 0 : index
    %c0_116 = arith.constant 0 : index
    %226 = vector.load %arg5[%c2_113, %c3_114, %c0_115, %c0_116] : memref<9x4x4x1xf32, #tpu.memory_space<vmem>>, vector<1x1x4x1xf32>
    %227 = vector.shape_cast %226 : vector<1x1x4x1xf32> to vector<4x1xf32>
    %228 = vector.extract_strided_slice %176 {offsets = [3, 0], sizes = [1, 256], strides = [1, 1]} : vector<4x256xf32> to vector<1x256xf32>
    %229 = vector.broadcast %227 : vector<4x1xf32> to vector<4x256xf32>
    %230 = vector.broadcast %228 : vector<1x256xf32> to vector<4x256xf32>
    %231 = arith.mulf %229, %230 : vector<4x256xf32>
    %232 = arith.addf %225, %231 : vector<4x256xf32>
    %c1_i32_117 = arith.constant 1 : i32
    %233 = tpu.dynamic_rotate %1 by %c1_i32_117 dim 1 : vector<4x256xf32>, i32 -> vector<4x256xf32>
    %c1_i32_118 = arith.constant 1 : i32
    %234 = tpu.dynamic_rotate %3 by %c1_i32_118 dim 1 : vector<4x256xf32>, i32 -> vector<4x256xf32>
    %c1_i32_119 = arith.constant 1 : i32
    %235 = vector.broadcast %c1_i32_119 : i32 to vector<1x256xi32>
    %236 = arith.cmpi sge, %20, %235 : vector<1x256xi32>
    %cst_120 = arith.constant 0.000000e+00 : f32
    %237 = vector.shape_cast %236 : vector<1x256xi1> to vector<1x256xi1>
    %238 = vector.broadcast %237 : vector<1x256xi1> to vector<4x256xi1>
    %239 = vector.broadcast %cst_120 : f32 to vector<4x256xf32>
    %240 = arith.select %238, %233, %239 : vector<4x256xi1>, vector<4x256xf32>
    %cst_121 = arith.constant 0.000000e+00 : f32
    %241 = vector.shape_cast %236 : vector<1x256xi1> to vector<1x256xi1>
    %242 = vector.broadcast %241 : vector<1x256xi1> to vector<4x256xi1>
    %243 = vector.broadcast %cst_121 : f32 to vector<4x256xf32>
    %244 = arith.select %242, %234, %243 : vector<4x256xi1>, vector<4x256xf32>
    %c3_122 = arith.constant 3 : index
    %c0_123 = arith.constant 0 : index
    %c0_124 = arith.constant 0 : index
    %c0_125 = arith.constant 0 : index
    %245 = vector.load %arg3[%c3_122, %c0_123, %c0_124, %c0_125] : memref<9x4x4x1xf32, #tpu.memory_space<vmem>>, vector<1x1x4x1xf32>
    %246 = vector.shape_cast %245 : vector<1x1x4x1xf32> to vector<4x1xf32>
    %247 = vector.extract_strided_slice %240 {offsets = [0, 0], sizes = [1, 256], strides = [1, 1]} : vector<4x256xf32> to vector<1x256xf32>
    %248 = vector.broadcast %246 : vector<4x1xf32> to vector<4x256xf32>
    %249 = vector.broadcast %247 : vector<1x256xf32> to vector<4x256xf32>
    %250 = arith.mulf %248, %249 : vector<4x256xf32>
    %251 = arith.addf %204, %250 : vector<4x256xf32>
    %c3_126 = arith.constant 3 : index
    %c1_127 = arith.constant 1 : index
    %c0_128 = arith.constant 0 : index
    %c0_129 = arith.constant 0 : index
    %252 = vector.load %arg3[%c3_126, %c1_127, %c0_128, %c0_129] : memref<9x4x4x1xf32, #tpu.memory_space<vmem>>, vector<1x1x4x1xf32>
    %253 = vector.shape_cast %252 : vector<1x1x4x1xf32> to vector<4x1xf32>
    %254 = vector.extract_strided_slice %240 {offsets = [1, 0], sizes = [1, 256], strides = [1, 1]} : vector<4x256xf32> to vector<1x256xf32>
    %255 = vector.broadcast %253 : vector<4x1xf32> to vector<4x256xf32>
    %256 = vector.broadcast %254 : vector<1x256xf32> to vector<4x256xf32>
    %257 = arith.mulf %255, %256 : vector<4x256xf32>
    %258 = arith.addf %251, %257 : vector<4x256xf32>
    %c3_130 = arith.constant 3 : index
    %c2_131 = arith.constant 2 : index
    %c0_132 = arith.constant 0 : index
    %c0_133 = arith.constant 0 : index
    %259 = vector.load %arg3[%c3_130, %c2_131, %c0_132, %c0_133] : memref<9x4x4x1xf32, #tpu.memory_space<vmem>>, vector<1x1x4x1xf32>
    %260 = vector.shape_cast %259 : vector<1x1x4x1xf32> to vector<4x1xf32>
    %261 = vector.extract_strided_slice %240 {offsets = [2, 0], sizes = [1, 256], strides = [1, 1]} : vector<4x256xf32> to vector<1x256xf32>
    %262 = vector.broadcast %260 : vector<4x1xf32> to vector<4x256xf32>
    %263 = vector.broadcast %261 : vector<1x256xf32> to vector<4x256xf32>
    %264 = arith.mulf %262, %263 : vector<4x256xf32>
    %265 = arith.addf %258, %264 : vector<4x256xf32>
    %c3_134 = arith.constant 3 : index
    %c3_135 = arith.constant 3 : index
    %c0_136 = arith.constant 0 : index
    %c0_137 = arith.constant 0 : index
    %266 = vector.load %arg3[%c3_134, %c3_135, %c0_136, %c0_137] : memref<9x4x4x1xf32, #tpu.memory_space<vmem>>, vector<1x1x4x1xf32>
    %267 = vector.shape_cast %266 : vector<1x1x4x1xf32> to vector<4x1xf32>
    %268 = vector.extract_strided_slice %240 {offsets = [3, 0], sizes = [1, 256], strides = [1, 1]} : vector<4x256xf32> to vector<1x256xf32>
    %269 = vector.broadcast %267 : vector<4x1xf32> to vector<4x256xf32>
    %270 = vector.broadcast %268 : vector<1x256xf32> to vector<4x256xf32>
    %271 = arith.mulf %269, %270 : vector<4x256xf32>
    %272 = arith.addf %265, %271 : vector<4x256xf32>
    %c3_138 = arith.constant 3 : index
    %c0_139 = arith.constant 0 : index
    %c0_140 = arith.constant 0 : index
    %c0_141 = arith.constant 0 : index
    %273 = vector.load %arg5[%c3_138, %c0_139, %c0_140, %c0_141] : memref<9x4x4x1xf32, #tpu.memory_space<vmem>>, vector<1x1x4x1xf32>
    %274 = vector.shape_cast %273 : vector<1x1x4x1xf32> to vector<4x1xf32>
    %275 = vector.extract_strided_slice %244 {offsets = [0, 0], sizes = [1, 256], strides = [1, 1]} : vector<4x256xf32> to vector<1x256xf32>
    %276 = vector.broadcast %274 : vector<4x1xf32> to vector<4x256xf32>
    %277 = vector.broadcast %275 : vector<1x256xf32> to vector<4x256xf32>
    %278 = arith.mulf %276, %277 : vector<4x256xf32>
    %279 = arith.addf %232, %278 : vector<4x256xf32>
    %c3_142 = arith.constant 3 : index
    %c1_143 = arith.constant 1 : index
    %c0_144 = arith.constant 0 : index
    %c0_145 = arith.constant 0 : index
    %280 = vector.load %arg5[%c3_142, %c1_143, %c0_144, %c0_145] : memref<9x4x4x1xf32, #tpu.memory_space<vmem>>, vector<1x1x4x1xf32>
    %281 = vector.shape_cast %280 : vector<1x1x4x1xf32> to vector<4x1xf32>
    %282 = vector.extract_strided_slice %244 {offsets = [1, 0], sizes = [1, 256], strides = [1, 1]} : vector<4x256xf32> to vector<1x256xf32>
    %283 = vector.broadcast %281 : vector<4x1xf32> to vector<4x256xf32>
    %284 = vector.broadcast %282 : vector<1x256xf32> to vector<4x256xf32>
    %285 = arith.mulf %283, %284 : vector<4x256xf32>
    %286 = arith.addf %279, %285 : vector<4x256xf32>
    %c3_146 = arith.constant 3 : index
    %c2_147 = arith.constant 2 : index
    %c0_148 = arith.constant 0 : index
    %c0_149 = arith.constant 0 : index
    %287 = vector.load %arg5[%c3_146, %c2_147, %c0_148, %c0_149] : memref<9x4x4x1xf32, #tpu.memory_space<vmem>>, vector<1x1x4x1xf32>
    %288 = vector.shape_cast %287 : vector<1x1x4x1xf32> to vector<4x1xf32>
    %289 = vector.extract_strided_slice %244 {offsets = [2, 0], sizes = [1, 256], strides = [1, 1]} : vector<4x256xf32> to vector<1x256xf32>
    %290 = vector.broadcast %288 : vector<4x1xf32> to vector<4x256xf32>
    %291 = vector.broadcast %289 : vector<1x256xf32> to vector<4x256xf32>
    %292 = arith.mulf %290, %291 : vector<4x256xf32>
    %293 = arith.addf %286, %292 : vector<4x256xf32>
    %c3_150 = arith.constant 3 : index
    %c3_151 = arith.constant 3 : index
    %c0_152 = arith.constant 0 : index
    %c0_153 = arith.constant 0 : index
    %294 = vector.load %arg5[%c3_150, %c3_151, %c0_152, %c0_153] : memref<9x4x4x1xf32, #tpu.memory_space<vmem>>, vector<1x1x4x1xf32>
    %295 = vector.shape_cast %294 : vector<1x1x4x1xf32> to vector<4x1xf32>
    %296 = vector.extract_strided_slice %244 {offsets = [3, 0], sizes = [1, 256], strides = [1, 1]} : vector<4x256xf32> to vector<1x256xf32>
    %297 = vector.broadcast %295 : vector<4x1xf32> to vector<4x256xf32>
    %298 = vector.broadcast %296 : vector<1x256xf32> to vector<4x256xf32>
    %299 = arith.mulf %297, %298 : vector<4x256xf32>
    %300 = arith.addf %293, %299 : vector<4x256xf32>
    %c4 = arith.constant 4 : index
    %c0_154 = arith.constant 0 : index
    %c0_155 = arith.constant 0 : index
    %c0_156 = arith.constant 0 : index
    %301 = vector.load %arg3[%c4, %c0_154, %c0_155, %c0_156] : memref<9x4x4x1xf32, #tpu.memory_space<vmem>>, vector<1x1x4x1xf32>
    %302 = vector.shape_cast %301 : vector<1x1x4x1xf32> to vector<4x1xf32>
    %303 = vector.extract_strided_slice %1 {offsets = [0, 0], sizes = [1, 256], strides = [1, 1]} : vector<4x256xf32> to vector<1x256xf32>
    %304 = vector.broadcast %302 : vector<4x1xf32> to vector<4x256xf32>
    %305 = vector.broadcast %303 : vector<1x256xf32> to vector<4x256xf32>
    %306 = arith.mulf %304, %305 : vector<4x256xf32>
    %307 = arith.addf %272, %306 : vector<4x256xf32>
    %c4_157 = arith.constant 4 : index
    %c1_158 = arith.constant 1 : index
    %c0_159 = arith.constant 0 : index
    %c0_160 = arith.constant 0 : index
    %308 = vector.load %arg3[%c4_157, %c1_158, %c0_159, %c0_160] : memref<9x4x4x1xf32, #tpu.memory_space<vmem>>, vector<1x1x4x1xf32>
    %309 = vector.shape_cast %308 : vector<1x1x4x1xf32> to vector<4x1xf32>
    %310 = vector.extract_strided_slice %1 {offsets = [1, 0], sizes = [1, 256], strides = [1, 1]} : vector<4x256xf32> to vector<1x256xf32>
    %311 = vector.broadcast %309 : vector<4x1xf32> to vector<4x256xf32>
    %312 = vector.broadcast %310 : vector<1x256xf32> to vector<4x256xf32>
    %313 = arith.mulf %311, %312 : vector<4x256xf32>
    %314 = arith.addf %307, %313 : vector<4x256xf32>
    %c4_161 = arith.constant 4 : index
    %c2_162 = arith.constant 2 : index
    %c0_163 = arith.constant 0 : index
    %c0_164 = arith.constant 0 : index
    %315 = vector.load %arg3[%c4_161, %c2_162, %c0_163, %c0_164] : memref<9x4x4x1xf32, #tpu.memory_space<vmem>>, vector<1x1x4x1xf32>
    %316 = vector.shape_cast %315 : vector<1x1x4x1xf32> to vector<4x1xf32>
    %317 = vector.extract_strided_slice %1 {offsets = [2, 0], sizes = [1, 256], strides = [1, 1]} : vector<4x256xf32> to vector<1x256xf32>
    %318 = vector.broadcast %316 : vector<4x1xf32> to vector<4x256xf32>
    %319 = vector.broadcast %317 : vector<1x256xf32> to vector<4x256xf32>
    %320 = arith.mulf %318, %319 : vector<4x256xf32>
    %321 = arith.addf %314, %320 : vector<4x256xf32>
    %c4_165 = arith.constant 4 : index
    %c3_166 = arith.constant 3 : index
    %c0_167 = arith.constant 0 : index
    %c0_168 = arith.constant 0 : index
    %322 = vector.load %arg3[%c4_165, %c3_166, %c0_167, %c0_168] : memref<9x4x4x1xf32, #tpu.memory_space<vmem>>, vector<1x1x4x1xf32>
    %323 = vector.shape_cast %322 : vector<1x1x4x1xf32> to vector<4x1xf32>
    %324 = vector.extract_strided_slice %1 {offsets = [3, 0], sizes = [1, 256], strides = [1, 1]} : vector<4x256xf32> to vector<1x256xf32>
    %325 = vector.broadcast %323 : vector<4x1xf32> to vector<4x256xf32>
    %326 = vector.broadcast %324 : vector<1x256xf32> to vector<4x256xf32>
    %327 = arith.mulf %325, %326 : vector<4x256xf32>
    %328 = arith.addf %321, %327 : vector<4x256xf32>
    %c4_169 = arith.constant 4 : index
    %c0_170 = arith.constant 0 : index
    %c0_171 = arith.constant 0 : index
    %c0_172 = arith.constant 0 : index
    %329 = vector.load %arg5[%c4_169, %c0_170, %c0_171, %c0_172] : memref<9x4x4x1xf32, #tpu.memory_space<vmem>>, vector<1x1x4x1xf32>
    %330 = vector.shape_cast %329 : vector<1x1x4x1xf32> to vector<4x1xf32>
    %331 = vector.extract_strided_slice %3 {offsets = [0, 0], sizes = [1, 256], strides = [1, 1]} : vector<4x256xf32> to vector<1x256xf32>
    %332 = vector.broadcast %330 : vector<4x1xf32> to vector<4x256xf32>
    %333 = vector.broadcast %331 : vector<1x256xf32> to vector<4x256xf32>
    %334 = arith.mulf %332, %333 : vector<4x256xf32>
    %335 = arith.addf %300, %334 : vector<4x256xf32>
    %c4_173 = arith.constant 4 : index
    %c1_174 = arith.constant 1 : index
    %c0_175 = arith.constant 0 : index
    %c0_176 = arith.constant 0 : index
    %336 = vector.load %arg5[%c4_173, %c1_174, %c0_175, %c0_176] : memref<9x4x4x1xf32, #tpu.memory_space<vmem>>, vector<1x1x4x1xf32>
    %337 = vector.shape_cast %336 : vector<1x1x4x1xf32> to vector<4x1xf32>
    %338 = vector.extract_strided_slice %3 {offsets = [1, 0], sizes = [1, 256], strides = [1, 1]} : vector<4x256xf32> to vector<1x256xf32>
    %339 = vector.broadcast %337 : vector<4x1xf32> to vector<4x256xf32>
    %340 = vector.broadcast %338 : vector<1x256xf32> to vector<4x256xf32>
    %341 = arith.mulf %339, %340 : vector<4x256xf32>
    %342 = arith.addf %335, %341 : vector<4x256xf32>
    %c4_177 = arith.constant 4 : index
    %c2_178 = arith.constant 2 : index
    %c0_179 = arith.constant 0 : index
    %c0_180 = arith.constant 0 : index
    %343 = vector.load %arg5[%c4_177, %c2_178, %c0_179, %c0_180] : memref<9x4x4x1xf32, #tpu.memory_space<vmem>>, vector<1x1x4x1xf32>
    %344 = vector.shape_cast %343 : vector<1x1x4x1xf32> to vector<4x1xf32>
    %345 = vector.extract_strided_slice %3 {offsets = [2, 0], sizes = [1, 256], strides = [1, 1]} : vector<4x256xf32> to vector<1x256xf32>
    %346 = vector.broadcast %344 : vector<4x1xf32> to vector<4x256xf32>
    %347 = vector.broadcast %345 : vector<1x256xf32> to vector<4x256xf32>
    %348 = arith.mulf %346, %347 : vector<4x256xf32>
    %349 = arith.addf %342, %348 : vector<4x256xf32>
    %c4_181 = arith.constant 4 : index
    %c3_182 = arith.constant 3 : index
    %c0_183 = arith.constant 0 : index
    %c0_184 = arith.constant 0 : index
    %350 = vector.load %arg5[%c4_181, %c3_182, %c0_183, %c0_184] : memref<9x4x4x1xf32, #tpu.memory_space<vmem>>, vector<1x1x4x1xf32>
    %351 = vector.shape_cast %350 : vector<1x1x4x1xf32> to vector<4x1xf32>
    %352 = vector.extract_strided_slice %3 {offsets = [3, 0], sizes = [1, 256], strides = [1, 1]} : vector<4x256xf32> to vector<1x256xf32>
    %353 = vector.broadcast %351 : vector<4x1xf32> to vector<4x256xf32>
    %354 = vector.broadcast %352 : vector<1x256xf32> to vector<4x256xf32>
    %355 = arith.mulf %353, %354 : vector<4x256xf32>
    %356 = arith.addf %349, %355 : vector<4x256xf32>
    %c255_i32 = arith.constant 255 : i32
    %357 = tpu.dynamic_rotate %1 by %c255_i32 dim 1 : vector<4x256xf32>, i32 -> vector<4x256xf32>
    %c255_i32_185 = arith.constant 255 : i32
    %358 = tpu.dynamic_rotate %3 by %c255_i32_185 dim 1 : vector<4x256xf32>, i32 -> vector<4x256xf32>
    %c15_i32_186 = arith.constant 15 : i32
    %359 = vector.broadcast %c15_i32_186 : i32 to vector<1x256xi32>
    %360 = arith.cmpi slt, %20, %359 : vector<1x256xi32>
    %cst_187 = arith.constant 0.000000e+00 : f32
    %361 = vector.shape_cast %360 : vector<1x256xi1> to vector<1x256xi1>
    %362 = vector.broadcast %361 : vector<1x256xi1> to vector<4x256xi1>
    %363 = vector.broadcast %cst_187 : f32 to vector<4x256xf32>
    %364 = arith.select %362, %357, %363 : vector<4x256xi1>, vector<4x256xf32>
    %cst_188 = arith.constant 0.000000e+00 : f32
    %365 = vector.shape_cast %360 : vector<1x256xi1> to vector<1x256xi1>
    %366 = vector.broadcast %365 : vector<1x256xi1> to vector<4x256xi1>
    %367 = vector.broadcast %cst_188 : f32 to vector<4x256xf32>
    %368 = arith.select %366, %358, %367 : vector<4x256xi1>, vector<4x256xf32>
    %c5 = arith.constant 5 : index
    %c0_189 = arith.constant 0 : index
    %c0_190 = arith.constant 0 : index
    %c0_191 = arith.constant 0 : index
    %369 = vector.load %arg3[%c5, %c0_189, %c0_190, %c0_191] : memref<9x4x4x1xf32, #tpu.memory_space<vmem>>, vector<1x1x4x1xf32>
    %370 = vector.shape_cast %369 : vector<1x1x4x1xf32> to vector<4x1xf32>
    %371 = vector.extract_strided_slice %364 {offsets = [0, 0], sizes = [1, 256], strides = [1, 1]} : vector<4x256xf32> to vector<1x256xf32>
    %372 = vector.broadcast %370 : vector<4x1xf32> to vector<4x256xf32>
    %373 = vector.broadcast %371 : vector<1x256xf32> to vector<4x256xf32>
    %374 = arith.mulf %372, %373 : vector<4x256xf32>
    %375 = arith.addf %328, %374 : vector<4x256xf32>
    %c5_192 = arith.constant 5 : index
    %c1_193 = arith.constant 1 : index
    %c0_194 = arith.constant 0 : index
    %c0_195 = arith.constant 0 : index
    %376 = vector.load %arg3[%c5_192, %c1_193, %c0_194, %c0_195] : memref<9x4x4x1xf32, #tpu.memory_space<vmem>>, vector<1x1x4x1xf32>
    %377 = vector.shape_cast %376 : vector<1x1x4x1xf32> to vector<4x1xf32>
    %378 = vector.extract_strided_slice %364 {offsets = [1, 0], sizes = [1, 256], strides = [1, 1]} : vector<4x256xf32> to vector<1x256xf32>
    %379 = vector.broadcast %377 : vector<4x1xf32> to vector<4x256xf32>
    %380 = vector.broadcast %378 : vector<1x256xf32> to vector<4x256xf32>
    %381 = arith.mulf %379, %380 : vector<4x256xf32>
    %382 = arith.addf %375, %381 : vector<4x256xf32>
    %c5_196 = arith.constant 5 : index
    %c2_197 = arith.constant 2 : index
    %c0_198 = arith.constant 0 : index
    %c0_199 = arith.constant 0 : index
    %383 = vector.load %arg3[%c5_196, %c2_197, %c0_198, %c0_199] : memref<9x4x4x1xf32, #tpu.memory_space<vmem>>, vector<1x1x4x1xf32>
    %384 = vector.shape_cast %383 : vector<1x1x4x1xf32> to vector<4x1xf32>
    %385 = vector.extract_strided_slice %364 {offsets = [2, 0], sizes = [1, 256], strides = [1, 1]} : vector<4x256xf32> to vector<1x256xf32>
    %386 = vector.broadcast %384 : vector<4x1xf32> to vector<4x256xf32>
    %387 = vector.broadcast %385 : vector<1x256xf32> to vector<4x256xf32>
    %388 = arith.mulf %386, %387 : vector<4x256xf32>
    %389 = arith.addf %382, %388 : vector<4x256xf32>
    %c5_200 = arith.constant 5 : index
    %c3_201 = arith.constant 3 : index
    %c0_202 = arith.constant 0 : index
    %c0_203 = arith.constant 0 : index
    %390 = vector.load %arg3[%c5_200, %c3_201, %c0_202, %c0_203] : memref<9x4x4x1xf32, #tpu.memory_space<vmem>>, vector<1x1x4x1xf32>
    %391 = vector.shape_cast %390 : vector<1x1x4x1xf32> to vector<4x1xf32>
    %392 = vector.extract_strided_slice %364 {offsets = [3, 0], sizes = [1, 256], strides = [1, 1]} : vector<4x256xf32> to vector<1x256xf32>
    %393 = vector.broadcast %391 : vector<4x1xf32> to vector<4x256xf32>
    %394 = vector.broadcast %392 : vector<1x256xf32> to vector<4x256xf32>
    %395 = arith.mulf %393, %394 : vector<4x256xf32>
    %396 = arith.addf %389, %395 : vector<4x256xf32>
    %c5_204 = arith.constant 5 : index
    %c0_205 = arith.constant 0 : index
    %c0_206 = arith.constant 0 : index
    %c0_207 = arith.constant 0 : index
    %397 = vector.load %arg5[%c5_204, %c0_205, %c0_206, %c0_207] : memref<9x4x4x1xf32, #tpu.memory_space<vmem>>, vector<1x1x4x1xf32>
    %398 = vector.shape_cast %397 : vector<1x1x4x1xf32> to vector<4x1xf32>
    %399 = vector.extract_strided_slice %368 {offsets = [0, 0], sizes = [1, 256], strides = [1, 1]} : vector<4x256xf32> to vector<1x256xf32>
    %400 = vector.broadcast %398 : vector<4x1xf32> to vector<4x256xf32>
    %401 = vector.broadcast %399 : vector<1x256xf32> to vector<4x256xf32>
    %402 = arith.mulf %400, %401 : vector<4x256xf32>
    %403 = arith.addf %356, %402 : vector<4x256xf32>
    %c5_208 = arith.constant 5 : index
    %c1_209 = arith.constant 1 : index
    %c0_210 = arith.constant 0 : index
    %c0_211 = arith.constant 0 : index
    %404 = vector.load %arg5[%c5_208, %c1_209, %c0_210, %c0_211] : memref<9x4x4x1xf32, #tpu.memory_space<vmem>>, vector<1x1x4x1xf32>
    %405 = vector.shape_cast %404 : vector<1x1x4x1xf32> to vector<4x1xf32>
    %406 = vector.extract_strided_slice %368 {offsets = [1, 0], sizes = [1, 256], strides = [1, 1]} : vector<4x256xf32> to vector<1x256xf32>
    %407 = vector.broadcast %405 : vector<4x1xf32> to vector<4x256xf32>
    %408 = vector.broadcast %406 : vector<1x256xf32> to vector<4x256xf32>
    %409 = arith.mulf %407, %408 : vector<4x256xf32>
    %410 = arith.addf %403, %409 : vector<4x256xf32>
    %c5_212 = arith.constant 5 : index
    %c2_213 = arith.constant 2 : index
    %c0_214 = arith.constant 0 : index
    %c0_215 = arith.constant 0 : index
    %411 = vector.load %arg5[%c5_212, %c2_213, %c0_214, %c0_215] : memref<9x4x4x1xf32, #tpu.memory_space<vmem>>, vector<1x1x4x1xf32>
    %412 = vector.shape_cast %411 : vector<1x1x4x1xf32> to vector<4x1xf32>
    %413 = vector.extract_strided_slice %368 {offsets = [2, 0], sizes = [1, 256], strides = [1, 1]} : vector<4x256xf32> to vector<1x256xf32>
    %414 = vector.broadcast %412 : vector<4x1xf32> to vector<4x256xf32>
    %415 = vector.broadcast %413 : vector<1x256xf32> to vector<4x256xf32>
    %416 = arith.mulf %414, %415 : vector<4x256xf32>
    %417 = arith.addf %410, %416 : vector<4x256xf32>
    %c5_216 = arith.constant 5 : index
    %c3_217 = arith.constant 3 : index
    %c0_218 = arith.constant 0 : index
    %c0_219 = arith.constant 0 : index
    %418 = vector.load %arg5[%c5_216, %c3_217, %c0_218, %c0_219] : memref<9x4x4x1xf32, #tpu.memory_space<vmem>>, vector<1x1x4x1xf32>
    %419 = vector.shape_cast %418 : vector<1x1x4x1xf32> to vector<4x1xf32>
    %420 = vector.extract_strided_slice %368 {offsets = [3, 0], sizes = [1, 256], strides = [1, 1]} : vector<4x256xf32> to vector<1x256xf32>
    %421 = vector.broadcast %419 : vector<4x1xf32> to vector<4x256xf32>
    %422 = vector.broadcast %420 : vector<1x256xf32> to vector<4x256xf32>
    %423 = arith.mulf %421, %422 : vector<4x256xf32>
    %424 = arith.addf %417, %423 : vector<4x256xf32>
    %c241_i32 = arith.constant 241 : i32
    %425 = tpu.dynamic_rotate %1 by %c241_i32 dim 1 : vector<4x256xf32>, i32 -> vector<4x256xf32>
    %c241_i32_220 = arith.constant 241 : i32
    %426 = tpu.dynamic_rotate %3 by %c241_i32_220 dim 1 : vector<4x256xf32>, i32 -> vector<4x256xf32>
    %c240_i32 = arith.constant 240 : i32
    %427 = vector.broadcast %c240_i32 : i32 to vector<1x256xi32>
    %428 = arith.cmpi slt, %4, %427 : vector<1x256xi32>
    %c1_i32_221 = arith.constant 1 : i32
    %429 = vector.broadcast %c1_i32_221 : i32 to vector<1x256xi32>
    %430 = arith.cmpi sge, %20, %429 : vector<1x256xi32>
    %431 = arith.andi %428, %430 : vector<1x256xi1>
    %cst_222 = arith.constant 0.000000e+00 : f32
    %432 = vector.shape_cast %431 : vector<1x256xi1> to vector<1x256xi1>
    %433 = vector.broadcast %432 : vector<1x256xi1> to vector<4x256xi1>
    %434 = vector.broadcast %cst_222 : f32 to vector<4x256xf32>
    %435 = arith.select %433, %425, %434 : vector<4x256xi1>, vector<4x256xf32>
    %cst_223 = arith.constant 0.000000e+00 : f32
    %436 = vector.shape_cast %431 : vector<1x256xi1> to vector<1x256xi1>
    %437 = vector.broadcast %436 : vector<1x256xi1> to vector<4x256xi1>
    %438 = vector.broadcast %cst_223 : f32 to vector<4x256xf32>
    %439 = arith.select %437, %426, %438 : vector<4x256xi1>, vector<4x256xf32>
    %c6 = arith.constant 6 : index
    %c0_224 = arith.constant 0 : index
    %c0_225 = arith.constant 0 : index
    %c0_226 = arith.constant 0 : index
    %440 = vector.load %arg3[%c6, %c0_224, %c0_225, %c0_226] : memref<9x4x4x1xf32, #tpu.memory_space<vmem>>, vector<1x1x4x1xf32>
    %441 = vector.shape_cast %440 : vector<1x1x4x1xf32> to vector<4x1xf32>
    %442 = vector.extract_strided_slice %435 {offsets = [0, 0], sizes = [1, 256], strides = [1, 1]} : vector<4x256xf32> to vector<1x256xf32>
    %443 = vector.broadcast %441 : vector<4x1xf32> to vector<4x256xf32>
    %444 = vector.broadcast %442 : vector<1x256xf32> to vector<4x256xf32>
    %445 = arith.mulf %443, %444 : vector<4x256xf32>
    %446 = arith.addf %396, %445 : vector<4x256xf32>
    %c6_227 = arith.constant 6 : index
    %c1_228 = arith.constant 1 : index
    %c0_229 = arith.constant 0 : index
    %c0_230 = arith.constant 0 : index
    %447 = vector.load %arg3[%c6_227, %c1_228, %c0_229, %c0_230] : memref<9x4x4x1xf32, #tpu.memory_space<vmem>>, vector<1x1x4x1xf32>
    %448 = vector.shape_cast %447 : vector<1x1x4x1xf32> to vector<4x1xf32>
    %449 = vector.extract_strided_slice %435 {offsets = [1, 0], sizes = [1, 256], strides = [1, 1]} : vector<4x256xf32> to vector<1x256xf32>
    %450 = vector.broadcast %448 : vector<4x1xf32> to vector<4x256xf32>
    %451 = vector.broadcast %449 : vector<1x256xf32> to vector<4x256xf32>
    %452 = arith.mulf %450, %451 : vector<4x256xf32>
    %453 = arith.addf %446, %452 : vector<4x256xf32>
    %c6_231 = arith.constant 6 : index
    %c2_232 = arith.constant 2 : index
    %c0_233 = arith.constant 0 : index
    %c0_234 = arith.constant 0 : index
    %454 = vector.load %arg3[%c6_231, %c2_232, %c0_233, %c0_234] : memref<9x4x4x1xf32, #tpu.memory_space<vmem>>, vector<1x1x4x1xf32>
    %455 = vector.shape_cast %454 : vector<1x1x4x1xf32> to vector<4x1xf32>
    %456 = vector.extract_strided_slice %435 {offsets = [2, 0], sizes = [1, 256], strides = [1, 1]} : vector<4x256xf32> to vector<1x256xf32>
    %457 = vector.broadcast %455 : vector<4x1xf32> to vector<4x256xf32>
    %458 = vector.broadcast %456 : vector<1x256xf32> to vector<4x256xf32>
    %459 = arith.mulf %457, %458 : vector<4x256xf32>
    %460 = arith.addf %453, %459 : vector<4x256xf32>
    %c6_235 = arith.constant 6 : index
    %c3_236 = arith.constant 3 : index
    %c0_237 = arith.constant 0 : index
    %c0_238 = arith.constant 0 : index
    %461 = vector.load %arg3[%c6_235, %c3_236, %c0_237, %c0_238] : memref<9x4x4x1xf32, #tpu.memory_space<vmem>>, vector<1x1x4x1xf32>
    %462 = vector.shape_cast %461 : vector<1x1x4x1xf32> to vector<4x1xf32>
    %463 = vector.extract_strided_slice %435 {offsets = [3, 0], sizes = [1, 256], strides = [1, 1]} : vector<4x256xf32> to vector<1x256xf32>
    %464 = vector.broadcast %462 : vector<4x1xf32> to vector<4x256xf32>
    %465 = vector.broadcast %463 : vector<1x256xf32> to vector<4x256xf32>
    %466 = arith.mulf %464, %465 : vector<4x256xf32>
    %467 = arith.addf %460, %466 : vector<4x256xf32>
    %c6_239 = arith.constant 6 : index
    %c0_240 = arith.constant 0 : index
    %c0_241 = arith.constant 0 : index
    %c0_242 = arith.constant 0 : index
    %468 = vector.load %arg5[%c6_239, %c0_240, %c0_241, %c0_242] : memref<9x4x4x1xf32, #tpu.memory_space<vmem>>, vector<1x1x4x1xf32>
    %469 = vector.shape_cast %468 : vector<1x1x4x1xf32> to vector<4x1xf32>
    %470 = vector.extract_strided_slice %439 {offsets = [0, 0], sizes = [1, 256], strides = [1, 1]} : vector<4x256xf32> to vector<1x256xf32>
    %471 = vector.broadcast %469 : vector<4x1xf32> to vector<4x256xf32>
    %472 = vector.broadcast %470 : vector<1x256xf32> to vector<4x256xf32>
    %473 = arith.mulf %471, %472 : vector<4x256xf32>
    %474 = arith.addf %424, %473 : vector<4x256xf32>
    %c6_243 = arith.constant 6 : index
    %c1_244 = arith.constant 1 : index
    %c0_245 = arith.constant 0 : index
    %c0_246 = arith.constant 0 : index
    %475 = vector.load %arg5[%c6_243, %c1_244, %c0_245, %c0_246] : memref<9x4x4x1xf32, #tpu.memory_space<vmem>>, vector<1x1x4x1xf32>
    %476 = vector.shape_cast %475 : vector<1x1x4x1xf32> to vector<4x1xf32>
    %477 = vector.extract_strided_slice %439 {offsets = [1, 0], sizes = [1, 256], strides = [1, 1]} : vector<4x256xf32> to vector<1x256xf32>
    %478 = vector.broadcast %476 : vector<4x1xf32> to vector<4x256xf32>
    %479 = vector.broadcast %477 : vector<1x256xf32> to vector<4x256xf32>
    %480 = arith.mulf %478, %479 : vector<4x256xf32>
    %481 = arith.addf %474, %480 : vector<4x256xf32>
    %c6_247 = arith.constant 6 : index
    %c2_248 = arith.constant 2 : index
    %c0_249 = arith.constant 0 : index
    %c0_250 = arith.constant 0 : index
    %482 = vector.load %arg5[%c6_247, %c2_248, %c0_249, %c0_250] : memref<9x4x4x1xf32, #tpu.memory_space<vmem>>, vector<1x1x4x1xf32>
    %483 = vector.shape_cast %482 : vector<1x1x4x1xf32> to vector<4x1xf32>
    %484 = vector.extract_strided_slice %439 {offsets = [2, 0], sizes = [1, 256], strides = [1, 1]} : vector<4x256xf32> to vector<1x256xf32>
    %485 = vector.broadcast %483 : vector<4x1xf32> to vector<4x256xf32>
    %486 = vector.broadcast %484 : vector<1x256xf32> to vector<4x256xf32>
    %487 = arith.mulf %485, %486 : vector<4x256xf32>
    %488 = arith.addf %481, %487 : vector<4x256xf32>
    %c6_251 = arith.constant 6 : index
    %c3_252 = arith.constant 3 : index
    %c0_253 = arith.constant 0 : index
    %c0_254 = arith.constant 0 : index
    %489 = vector.load %arg5[%c6_251, %c3_252, %c0_253, %c0_254] : memref<9x4x4x1xf32, #tpu.memory_space<vmem>>, vector<1x1x4x1xf32>
    %490 = vector.shape_cast %489 : vector<1x1x4x1xf32> to vector<4x1xf32>
    %491 = vector.extract_strided_slice %439 {offsets = [3, 0], sizes = [1, 256], strides = [1, 1]} : vector<4x256xf32> to vector<1x256xf32>
    %492 = vector.broadcast %490 : vector<4x1xf32> to vector<4x256xf32>
    %493 = vector.broadcast %491 : vector<1x256xf32> to vector<4x256xf32>
    %494 = arith.mulf %492, %493 : vector<4x256xf32>
    %495 = arith.addf %488, %494 : vector<4x256xf32>
    %c240_i32_255 = arith.constant 240 : i32
    %496 = tpu.dynamic_rotate %1 by %c240_i32_255 dim 1 : vector<4x256xf32>, i32 -> vector<4x256xf32>
    %c240_i32_256 = arith.constant 240 : i32
    %497 = tpu.dynamic_rotate %3 by %c240_i32_256 dim 1 : vector<4x256xf32>, i32 -> vector<4x256xf32>
    %c240_i32_257 = arith.constant 240 : i32
    %498 = vector.broadcast %c240_i32_257 : i32 to vector<1x256xi32>
    %499 = arith.cmpi slt, %4, %498 : vector<1x256xi32>
    %cst_258 = arith.constant 0.000000e+00 : f32
    %500 = vector.shape_cast %499 : vector<1x256xi1> to vector<1x256xi1>
    %501 = vector.broadcast %500 : vector<1x256xi1> to vector<4x256xi1>
    %502 = vector.broadcast %cst_258 : f32 to vector<4x256xf32>
    %503 = arith.select %501, %496, %502 : vector<4x256xi1>, vector<4x256xf32>
    %cst_259 = arith.constant 0.000000e+00 : f32
    %504 = vector.shape_cast %499 : vector<1x256xi1> to vector<1x256xi1>
    %505 = vector.broadcast %504 : vector<1x256xi1> to vector<4x256xi1>
    %506 = vector.broadcast %cst_259 : f32 to vector<4x256xf32>
    %507 = arith.select %505, %497, %506 : vector<4x256xi1>, vector<4x256xf32>
    %c7 = arith.constant 7 : index
    %c0_260 = arith.constant 0 : index
    %c0_261 = arith.constant 0 : index
    %c0_262 = arith.constant 0 : index
    %508 = vector.load %arg3[%c7, %c0_260, %c0_261, %c0_262] : memref<9x4x4x1xf32, #tpu.memory_space<vmem>>, vector<1x1x4x1xf32>
    %509 = vector.shape_cast %508 : vector<1x1x4x1xf32> to vector<4x1xf32>
    %510 = vector.extract_strided_slice %503 {offsets = [0, 0], sizes = [1, 256], strides = [1, 1]} : vector<4x256xf32> to vector<1x256xf32>
    %511 = vector.broadcast %509 : vector<4x1xf32> to vector<4x256xf32>
    %512 = vector.broadcast %510 : vector<1x256xf32> to vector<4x256xf32>
    %513 = arith.mulf %511, %512 : vector<4x256xf32>
    %514 = arith.addf %467, %513 : vector<4x256xf32>
    %c7_263 = arith.constant 7 : index
    %c1_264 = arith.constant 1 : index
    %c0_265 = arith.constant 0 : index
    %c0_266 = arith.constant 0 : index
    %515 = vector.load %arg3[%c7_263, %c1_264, %c0_265, %c0_266] : memref<9x4x4x1xf32, #tpu.memory_space<vmem>>, vector<1x1x4x1xf32>
    %516 = vector.shape_cast %515 : vector<1x1x4x1xf32> to vector<4x1xf32>
    %517 = vector.extract_strided_slice %503 {offsets = [1, 0], sizes = [1, 256], strides = [1, 1]} : vector<4x256xf32> to vector<1x256xf32>
    %518 = vector.broadcast %516 : vector<4x1xf32> to vector<4x256xf32>
    %519 = vector.broadcast %517 : vector<1x256xf32> to vector<4x256xf32>
    %520 = arith.mulf %518, %519 : vector<4x256xf32>
    %521 = arith.addf %514, %520 : vector<4x256xf32>
    %c7_267 = arith.constant 7 : index
    %c2_268 = arith.constant 2 : index
    %c0_269 = arith.constant 0 : index
    %c0_270 = arith.constant 0 : index
    %522 = vector.load %arg3[%c7_267, %c2_268, %c0_269, %c0_270] : memref<9x4x4x1xf32, #tpu.memory_space<vmem>>, vector<1x1x4x1xf32>
    %523 = vector.shape_cast %522 : vector<1x1x4x1xf32> to vector<4x1xf32>
    %524 = vector.extract_strided_slice %503 {offsets = [2, 0], sizes = [1, 256], strides = [1, 1]} : vector<4x256xf32> to vector<1x256xf32>
    %525 = vector.broadcast %523 : vector<4x1xf32> to vector<4x256xf32>
    %526 = vector.broadcast %524 : vector<1x256xf32> to vector<4x256xf32>
    %527 = arith.mulf %525, %526 : vector<4x256xf32>
    %528 = arith.addf %521, %527 : vector<4x256xf32>
    %c7_271 = arith.constant 7 : index
    %c3_272 = arith.constant 3 : index
    %c0_273 = arith.constant 0 : index
    %c0_274 = arith.constant 0 : index
    %529 = vector.load %arg3[%c7_271, %c3_272, %c0_273, %c0_274] : memref<9x4x4x1xf32, #tpu.memory_space<vmem>>, vector<1x1x4x1xf32>
    %530 = vector.shape_cast %529 : vector<1x1x4x1xf32> to vector<4x1xf32>
    %531 = vector.extract_strided_slice %503 {offsets = [3, 0], sizes = [1, 256], strides = [1, 1]} : vector<4x256xf32> to vector<1x256xf32>
    %532 = vector.broadcast %530 : vector<4x1xf32> to vector<4x256xf32>
    %533 = vector.broadcast %531 : vector<1x256xf32> to vector<4x256xf32>
    %534 = arith.mulf %532, %533 : vector<4x256xf32>
    %535 = arith.addf %528, %534 : vector<4x256xf32>
    %c7_275 = arith.constant 7 : index
    %c0_276 = arith.constant 0 : index
    %c0_277 = arith.constant 0 : index
    %c0_278 = arith.constant 0 : index
    %536 = vector.load %arg5[%c7_275, %c0_276, %c0_277, %c0_278] : memref<9x4x4x1xf32, #tpu.memory_space<vmem>>, vector<1x1x4x1xf32>
    %537 = vector.shape_cast %536 : vector<1x1x4x1xf32> to vector<4x1xf32>
    %538 = vector.extract_strided_slice %507 {offsets = [0, 0], sizes = [1, 256], strides = [1, 1]} : vector<4x256xf32> to vector<1x256xf32>
    %539 = vector.broadcast %537 : vector<4x1xf32> to vector<4x256xf32>
    %540 = vector.broadcast %538 : vector<1x256xf32> to vector<4x256xf32>
    %541 = arith.mulf %539, %540 : vector<4x256xf32>
    %542 = arith.addf %495, %541 : vector<4x256xf32>
    %c7_279 = arith.constant 7 : index
    %c1_280 = arith.constant 1 : index
    %c0_281 = arith.constant 0 : index
    %c0_282 = arith.constant 0 : index
    %543 = vector.load %arg5[%c7_279, %c1_280, %c0_281, %c0_282] : memref<9x4x4x1xf32, #tpu.memory_space<vmem>>, vector<1x1x4x1xf32>
    %544 = vector.shape_cast %543 : vector<1x1x4x1xf32> to vector<4x1xf32>
    %545 = vector.extract_strided_slice %507 {offsets = [1, 0], sizes = [1, 256], strides = [1, 1]} : vector<4x256xf32> to vector<1x256xf32>
    %546 = vector.broadcast %544 : vector<4x1xf32> to vector<4x256xf32>
    %547 = vector.broadcast %545 : vector<1x256xf32> to vector<4x256xf32>
    %548 = arith.mulf %546, %547 : vector<4x256xf32>
    %549 = arith.addf %542, %548 : vector<4x256xf32>
    %c7_283 = arith.constant 7 : index
    %c2_284 = arith.constant 2 : index
    %c0_285 = arith.constant 0 : index
    %c0_286 = arith.constant 0 : index
    %550 = vector.load %arg5[%c7_283, %c2_284, %c0_285, %c0_286] : memref<9x4x4x1xf32, #tpu.memory_space<vmem>>, vector<1x1x4x1xf32>
    %551 = vector.shape_cast %550 : vector<1x1x4x1xf32> to vector<4x1xf32>
    %552 = vector.extract_strided_slice %507 {offsets = [2, 0], sizes = [1, 256], strides = [1, 1]} : vector<4x256xf32> to vector<1x256xf32>
    %553 = vector.broadcast %551 : vector<4x1xf32> to vector<4x256xf32>
    %554 = vector.broadcast %552 : vector<1x256xf32> to vector<4x256xf32>
    %555 = arith.mulf %553, %554 : vector<4x256xf32>
    %556 = arith.addf %549, %555 : vector<4x256xf32>
    %c7_287 = arith.constant 7 : index
    %c3_288 = arith.constant 3 : index
    %c0_289 = arith.constant 0 : index
    %c0_290 = arith.constant 0 : index
    %557 = vector.load %arg5[%c7_287, %c3_288, %c0_289, %c0_290] : memref<9x4x4x1xf32, #tpu.memory_space<vmem>>, vector<1x1x4x1xf32>
    %558 = vector.shape_cast %557 : vector<1x1x4x1xf32> to vector<4x1xf32>
    %559 = vector.extract_strided_slice %507 {offsets = [3, 0], sizes = [1, 256], strides = [1, 1]} : vector<4x256xf32> to vector<1x256xf32>
    %560 = vector.broadcast %558 : vector<4x1xf32> to vector<4x256xf32>
    %561 = vector.broadcast %559 : vector<1x256xf32> to vector<4x256xf32>
    %562 = arith.mulf %560, %561 : vector<4x256xf32>
    %563 = arith.addf %556, %562 : vector<4x256xf32>
    %c239_i32 = arith.constant 239 : i32
    %564 = tpu.dynamic_rotate %1 by %c239_i32 dim 1 : vector<4x256xf32>, i32 -> vector<4x256xf32>
    %c239_i32_291 = arith.constant 239 : i32
    %565 = tpu.dynamic_rotate %3 by %c239_i32_291 dim 1 : vector<4x256xf32>, i32 -> vector<4x256xf32>
    %c240_i32_292 = arith.constant 240 : i32
    %566 = vector.broadcast %c240_i32_292 : i32 to vector<1x256xi32>
    %567 = arith.cmpi slt, %4, %566 : vector<1x256xi32>
    %c15_i32_293 = arith.constant 15 : i32
    %568 = vector.broadcast %c15_i32_293 : i32 to vector<1x256xi32>
    %569 = arith.cmpi slt, %20, %568 : vector<1x256xi32>
    %570 = arith.andi %567, %569 : vector<1x256xi1>
    %cst_294 = arith.constant 0.000000e+00 : f32
    %571 = vector.shape_cast %570 : vector<1x256xi1> to vector<1x256xi1>
    %572 = vector.broadcast %571 : vector<1x256xi1> to vector<4x256xi1>
    %573 = vector.broadcast %cst_294 : f32 to vector<4x256xf32>
    %574 = arith.select %572, %564, %573 : vector<4x256xi1>, vector<4x256xf32>
    %cst_295 = arith.constant 0.000000e+00 : f32
    %575 = vector.shape_cast %570 : vector<1x256xi1> to vector<1x256xi1>
    %576 = vector.broadcast %575 : vector<1x256xi1> to vector<4x256xi1>
    %577 = vector.broadcast %cst_295 : f32 to vector<4x256xf32>
    %578 = arith.select %576, %565, %577 : vector<4x256xi1>, vector<4x256xf32>
    %c8 = arith.constant 8 : index
    %c0_296 = arith.constant 0 : index
    %c0_297 = arith.constant 0 : index
    %c0_298 = arith.constant 0 : index
    %579 = vector.load %arg3[%c8, %c0_296, %c0_297, %c0_298] : memref<9x4x4x1xf32, #tpu.memory_space<vmem>>, vector<1x1x4x1xf32>
    %580 = vector.shape_cast %579 : vector<1x1x4x1xf32> to vector<4x1xf32>
    %581 = vector.extract_strided_slice %574 {offsets = [0, 0], sizes = [1, 256], strides = [1, 1]} : vector<4x256xf32> to vector<1x256xf32>
    %582 = vector.broadcast %580 : vector<4x1xf32> to vector<4x256xf32>
    %583 = vector.broadcast %581 : vector<1x256xf32> to vector<4x256xf32>
    %584 = arith.mulf %582, %583 : vector<4x256xf32>
    %585 = arith.addf %535, %584 : vector<4x256xf32>
    %c8_299 = arith.constant 8 : index
    %c1_300 = arith.constant 1 : index
    %c0_301 = arith.constant 0 : index
    %c0_302 = arith.constant 0 : index
    %586 = vector.load %arg3[%c8_299, %c1_300, %c0_301, %c0_302] : memref<9x4x4x1xf32, #tpu.memory_space<vmem>>, vector<1x1x4x1xf32>
    %587 = vector.shape_cast %586 : vector<1x1x4x1xf32> to vector<4x1xf32>
    %588 = vector.extract_strided_slice %574 {offsets = [1, 0], sizes = [1, 256], strides = [1, 1]} : vector<4x256xf32> to vector<1x256xf32>
    %589 = vector.broadcast %587 : vector<4x1xf32> to vector<4x256xf32>
    %590 = vector.broadcast %588 : vector<1x256xf32> to vector<4x256xf32>
    %591 = arith.mulf %589, %590 : vector<4x256xf32>
    %592 = arith.addf %585, %591 : vector<4x256xf32>
    %c8_303 = arith.constant 8 : index
    %c2_304 = arith.constant 2 : index
    %c0_305 = arith.constant 0 : index
    %c0_306 = arith.constant 0 : index
    %593 = vector.load %arg3[%c8_303, %c2_304, %c0_305, %c0_306] : memref<9x4x4x1xf32, #tpu.memory_space<vmem>>, vector<1x1x4x1xf32>
    %594 = vector.shape_cast %593 : vector<1x1x4x1xf32> to vector<4x1xf32>
    %595 = vector.extract_strided_slice %574 {offsets = [2, 0], sizes = [1, 256], strides = [1, 1]} : vector<4x256xf32> to vector<1x256xf32>
    %596 = vector.broadcast %594 : vector<4x1xf32> to vector<4x256xf32>
    %597 = vector.broadcast %595 : vector<1x256xf32> to vector<4x256xf32>
    %598 = arith.mulf %596, %597 : vector<4x256xf32>
    %599 = arith.addf %592, %598 : vector<4x256xf32>
    %c8_307 = arith.constant 8 : index
    %c3_308 = arith.constant 3 : index
    %c0_309 = arith.constant 0 : index
    %c0_310 = arith.constant 0 : index
    %600 = vector.load %arg3[%c8_307, %c3_308, %c0_309, %c0_310] : memref<9x4x4x1xf32, #tpu.memory_space<vmem>>, vector<1x1x4x1xf32>
    %601 = vector.shape_cast %600 : vector<1x1x4x1xf32> to vector<4x1xf32>
    %602 = vector.extract_strided_slice %574 {offsets = [3, 0], sizes = [1, 256], strides = [1, 1]} : vector<4x256xf32> to vector<1x256xf32>
    %603 = vector.broadcast %601 : vector<4x1xf32> to vector<4x256xf32>
    %604 = vector.broadcast %602 : vector<1x256xf32> to vector<4x256xf32>
    %605 = arith.mulf %603, %604 : vector<4x256xf32>
    %606 = arith.addf %599, %605 : vector<4x256xf32>
    %c8_311 = arith.constant 8 : index
    %c0_312 = arith.constant 0 : index
    %c0_313 = arith.constant 0 : index
    %c0_314 = arith.constant 0 : index
    %607 = vector.load %arg5[%c8_311, %c0_312, %c0_313, %c0_314] : memref<9x4x4x1xf32, #tpu.memory_space<vmem>>, vector<1x1x4x1xf32>
    %608 = vector.shape_cast %607 : vector<1x1x4x1xf32> to vector<4x1xf32>
    %609 = vector.extract_strided_slice %578 {offsets = [0, 0], sizes = [1, 256], strides = [1, 1]} : vector<4x256xf32> to vector<1x256xf32>
    %610 = vector.broadcast %608 : vector<4x1xf32> to vector<4x256xf32>
    %611 = vector.broadcast %609 : vector<1x256xf32> to vector<4x256xf32>
    %612 = arith.mulf %610, %611 : vector<4x256xf32>
    %613 = arith.addf %563, %612 : vector<4x256xf32>
    %c8_315 = arith.constant 8 : index
    %c1_316 = arith.constant 1 : index
    %c0_317 = arith.constant 0 : index
    %c0_318 = arith.constant 0 : index
    %614 = vector.load %arg5[%c8_315, %c1_316, %c0_317, %c0_318] : memref<9x4x4x1xf32, #tpu.memory_space<vmem>>, vector<1x1x4x1xf32>
    %615 = vector.shape_cast %614 : vector<1x1x4x1xf32> to vector<4x1xf32>
    %616 = vector.extract_strided_slice %578 {offsets = [1, 0], sizes = [1, 256], strides = [1, 1]} : vector<4x256xf32> to vector<1x256xf32>
    %617 = vector.broadcast %615 : vector<4x1xf32> to vector<4x256xf32>
    %618 = vector.broadcast %616 : vector<1x256xf32> to vector<4x256xf32>
    %619 = arith.mulf %617, %618 : vector<4x256xf32>
    %620 = arith.addf %613, %619 : vector<4x256xf32>
    %c8_319 = arith.constant 8 : index
    %c2_320 = arith.constant 2 : index
    %c0_321 = arith.constant 0 : index
    %c0_322 = arith.constant 0 : index
    %621 = vector.load %arg5[%c8_319, %c2_320, %c0_321, %c0_322] : memref<9x4x4x1xf32, #tpu.memory_space<vmem>>, vector<1x1x4x1xf32>
    %622 = vector.shape_cast %621 : vector<1x1x4x1xf32> to vector<4x1xf32>
    %623 = vector.extract_strided_slice %578 {offsets = [2, 0], sizes = [1, 256], strides = [1, 1]} : vector<4x256xf32> to vector<1x256xf32>
    %624 = vector.broadcast %622 : vector<4x1xf32> to vector<4x256xf32>
    %625 = vector.broadcast %623 : vector<1x256xf32> to vector<4x256xf32>
    %626 = arith.mulf %624, %625 : vector<4x256xf32>
    %627 = arith.addf %620, %626 : vector<4x256xf32>
    %c8_323 = arith.constant 8 : index
    %c3_324 = arith.constant 3 : index
    %c0_325 = arith.constant 0 : index
    %c0_326 = arith.constant 0 : index
    %628 = vector.load %arg5[%c8_323, %c3_324, %c0_325, %c0_326] : memref<9x4x4x1xf32, #tpu.memory_space<vmem>>, vector<1x1x4x1xf32>
    %629 = vector.shape_cast %628 : vector<1x1x4x1xf32> to vector<4x1xf32>
    %630 = vector.extract_strided_slice %578 {offsets = [3, 0], sizes = [1, 256], strides = [1, 1]} : vector<4x256xf32> to vector<1x256xf32>
    %631 = vector.broadcast %629 : vector<4x1xf32> to vector<4x256xf32>
    %632 = vector.broadcast %630 : vector<1x256xf32> to vector<4x256xf32>
    %633 = arith.mulf %631, %632 : vector<4x256xf32>
    %634 = arith.addf %627, %633 : vector<4x256xf32>
    %c0_327 = arith.constant 0 : index
    %c0_328 = arith.constant 0 : index
    %635 = vector.load %arg4[%c0_327, %c0_328] : memref<4x1xf32, #tpu.memory_space<vmem>>, vector<4x1xf32>
    %636 = vector.broadcast %635 : vector<4x1xf32> to vector<4x256xf32>
    %637 = arith.addf %606, %636 : vector<4x256xf32>
    %cst_329 = arith.constant 0.000000e+00 : f32
    %638 = vector.broadcast %cst_329 : f32 to vector<4x256xf32>
    %639 = arith.maximumf %637, %638 : vector<4x256xf32>
    %640 = math.tanh %634 : vector<4x256xf32>
    %cst_330 = arith.constant 1.010000e+00 : f32
    %641 = vector.broadcast %cst_330 : f32 to vector<4x256xf32>
    %642 = arith.addf %640, %641 : vector<4x256xf32>
    %643 = math.log %642 : vector<4x256xf32>
    %cst_331 = arith.constant -9.99999974E-5 : f32
    %644 = vector.broadcast %cst_331 : f32 to vector<4x256xf32>
    %645 = arith.mulf %644, %643 : vector<4x256xf32>
    %cst_332 = arith.constant 5.000000e-01 : f32
    %646 = vector.broadcast %cst_332 : f32 to vector<4x256xf32>
    %647 = arith.mulf %646, %645 : vector<4x256xf32>
    %cst_333 = arith.constant 1.000000e+00 : f32
    %648 = vector.broadcast %cst_333 : f32 to vector<4x256xf32>
    %649 = arith.addf %648, %647 : vector<4x256xf32>
    %650 = arith.mulf %645, %649 : vector<4x256xf32>
    %cst_334 = arith.constant 1.000000e+00 : f32
    %651 = vector.broadcast %cst_334 : f32 to vector<4x256xf32>
    %652 = arith.addf %651, %650 : vector<4x256xf32>
    %653 = arith.mulf %642, %652 : vector<4x256xf32>
    %654 = arith.addf %653, %639 : vector<4x256xf32>
    %c0_335 = arith.constant 0 : index
    %c0_336 = arith.constant 0 : index
    %c0_337 = arith.constant 0 : index
    %655 = vector.load %arg6[%c0_335, %c0_336, %c0_337] : memref<1x4x256xf32, #tpu.memory_space<vmem>>, vector<1x4x256xf32>
    %656 = vector.shape_cast %655 : vector<1x4x256xf32> to vector<4x256xf32>
    %657 = vector.shape_cast %654 : vector<4x256xf32> to vector<1x4x256xf32>
    tpu.vector_store %arg6[%c0_335, %c0_336, %c0_337], %657 {strides = array<i32>} : memref<1x4x256xf32, #tpu.memory_space<vmem>>, vector<1x4x256xf32>,
    return
  }
  func.func @transform_0(%arg0: i32) -> (i32, i32, i32) {
    %c0_i32 = arith.constant 0 : i32
    %c0_i32_0 = arith.constant 0 : i32
    %c0_i32_1 = arith.constant 0 : i32
    return %arg0, %c0_i32, %c0_i32_0 : i32, i32, i32
  }
  func.func @transform_1(%arg0: i32) -> (i32, i32, i32) {
    %c0_i32 = arith.constant 0 : i32
    %c0_i32_0 = arith.constant 0 : i32
    %c0_i32_1 = arith.constant 0 : i32
    return %arg0, %c0_i32, %c0_i32_0 : i32, i32, i32
  }
  func.func @transform_2(%arg0: i32) -> (i32, i32, i32, i32) {
    %c0_i32 = arith.constant 0 : i32
    %c0_i32_0 = arith.constant 0 : i32
    %c0_i32_1 = arith.constant 0 : i32
    %c0_i32_2 = arith.constant 0 : i32
    %c0_i32_3 = arith.constant 0 : i32
    return %c0_i32, %c0_i32_0, %c0_i32_1, %c0_i32_2 : i32, i32, i32, i32
  }
  func.func @transform_3(%arg0: i32) -> (i32, i32) {
    %c0_i32 = arith.constant 0 : i32
    %c0_i32_0 = arith.constant 0 : i32
    %c0_i32_1 = arith.constant 0 : i32
    return %c0_i32, %c0_i32_0 : i32, i32
  }
  func.func @transform_4(%arg0: i32) -> (i32, i32, i32, i32) {
    %c0_i32 = arith.constant 0 : i32
    %c0_i32_0 = arith.constant 0 : i32
    %c0_i32_1 = arith.constant 0 : i32
    %c0_i32_2 = arith.constant 0 : i32
    %c0_i32_3 = arith.constant 0 : i32
    return %c0_i32, %c0_i32_0, %c0_i32_1, %c0_i32_2 : i32, i32, i32, i32
  }
  func.func @transform_5(%arg0: i32) -> (i32, i32, i32) {
    %c0_i32 = arith.constant 0 : i32
    %c0_i32_0 = arith.constant 0 : i32
    %c0_i32_1 = arith.constant 0 : i32
    return %arg0, %c0_i32, %c0_i32_0 : i32, i32, i32
  }
}

</mosaic_0001>

<bundles_post_ra>
// kernel: tpu_custom_call.1
= control target key start
LH: loop header
LB: loop body
LE: loop exit
PB: predicated region body
PF: predicated region fallthrough
CT: control target
= control target key end

     0   :  { %10 = vsyncpa [#allocation3], 0  ;;  %s3142_s0 = inlined_call_operand.vmem [shape: f32[2,4,256], index: 0, kind: input, shape index: {}]   ;;  %s3143_s1 = inlined_call_operand.vmem [shape: f32[2,4,256], index: 1, kind: input, shape index: {}]   ;;  %s3144_s2 = inlined_call_operand.vmem [shape: f32[9,4,4,1], index: 2, kind: input, shape index: {}]   ;;  %s3145_s3 = inlined_call_operand.vmem [shape: f32[4,1], index: 3, kind: input, shape index: {}]   ;;  %s3146_s4 = inlined_call_operand.vmem [shape: f32[9,4,4,1], index: 4, kind: input, shape index: {}]   ;;  %s3147_s5 = inlined_call_operand.hbm [shape: f32[2,4,256], index: 5, kind: output, shape index: {}]  }
   0x1   :  { %12 = vsyncpa [#allocation3 + $0x1], 0  ;;  %s2283_s18 = smov 0   ;;  %s2285_s19 = smov 0  }
   0x2   :  { %s2287_s20 = smov 0   ;;  %s2289_s21 = smov 0  }
   0x3 LB: > { %s2304_s22 = sadd.s32 4294967295, %s2241_s21   ;;  %s2031_s23 = sadd.s32 4294967294, %s2241_s21   ;;  %s2241_s21 = sphi %s2289_s21, %s3169_s21   ;;  %s2237_s20 = sphi %s2287_s20, %s3168_s20   ;;  %s2233_s19 = sphi %s2285_s19, %s3167_s19   ;;  %s2229_s18 = sphi %s2283_s18, %s3166_s18  }
   0x4   : > { %s2308_s24 = sadd.s32 1, %s2241_s21   ;;  %s140_s25 = sadd.s32 1, %s2237_s20 }
   0x5   : > { %s137_s26 = ssub.s32 %s2241_s21, %s2308_s24  ;;  %p150_p0 = scmp.ne.s32.totalorder %s2237_s20, %s2233_s19 }
   0x6   : > { %p138_p1 = scmp.eq.s32.totalorder %s137_s26, 0  ;;  %p151_p2 = scmp.eq.s32.totalorder %s2304_s22, 1 }
   0x7   : > { %p156_p3 = scmp.ne.s32.totalorder %s2233_s19, %s2229_s18  ;;  %p157_p4 = scmp.eq.s32.totalorder %s2031_s23, 1 }
   0x8   : > { %s2319_s27 = scalar_select %p138_p1, %s2237_s20, %s140_s25  }
   0x9   : > { %p2321_p5 = por %p151_p2, %p150_p0  ;;  %p2325_p6 = por %p157_p4, %p156_p3 }
   0xa   : > { %p2034_p7 = scmp.ge.s32.totalorder %s2241_s21, 1  ;;  %p200_p8 = scmp.lt.s32.totalorder %s2241_s21, 3 }
   0xc   : > { %p201_p9 = pnand %p2034_p7, %p200_p8 }
   0xd   : > { %p233_p10 = scmp.lt.s32.totalorder (!%p201_p9), %s2304_s22, 1  ;;  %v2243_v0 = vmov (!%p201_p9), 0   ;;  %s2244_s13 = smov (!%p201_p9), 17   ;;  %v2040_v4 = vld [vmem:[%s3144_s2 + $0x4] sm:$0xf] (!%p201_p9)  ;;  %v245_v49 = vlaneseq (!%p201_p9) }
   0xe   : > { %204 = sbr.rel (%p201_p9) target bundleno = 392 (0x188), region = 40  ;;  %2167 = vset.pattern.permute.xlu1 (!%p201_p9), %v2243_v0  ;;  %2166 = vset.pattern.permute.xlu0 (!%p201_p9), %v2243_v0  ;;  %v305_v6 = vld [vmem:[%s3144_s2] sm:$0xf] (!%p201_p9)  ;;  %v2041_v7 = vld [vmem:[%s3144_s2 + $0x8] sm:$0xf] (!%p201_p9)  ;;  %s2245_s15 = smov (!%p201_p9), 16  }
   0xf   : > { %v2042_v8 = vld [vmem:[%s3144_s2 + $0xc] sm:$0xf] (!%p201_p9)  ;;  %v380_v9 = vld [vmem:[%s3146_s4] sm:$0xf] (!%p201_p9)  ;;  %v2043_v10 = vld [vmem:[%s3146_s4 + $0x4] sm:$0xf] (!%p201_p9) }
  0x10   : > { %v2044_v11 = vld [vmem:[%s3146_s4 + $0x8] sm:$0xf] (!%p201_p9)  ;;  %v2045_v12 = vld [vmem:[%s3146_s4 + $0xc] sm:$0xf] (!%p201_p9)  ;;  %v2046_v13 = vld [vmem:[%s3144_s2 + $0x10] sm:$0xf] (!%p201_p9) }
  0x11   : > { %v2047_v14 = vld [vmem:[%s3144_s2 + $0x14] sm:$0xf] (!%p201_p9)  ;;  %v2048_v15 = vld [vmem:[%s3144_s2 + $0x18] sm:$0xf] (!%p201_p9)  ;;  %v2049_v16 = vld [vmem:[%s3144_s2 + $0x1c] sm:$0xf] (!%p201_p9) }
  0x12   : > { %v2050_v17 = vld [vmem:[%s3146_s4 + $0x10] sm:$0xf] (!%p201_p9)  ;;  %v2051_v18 = vld [vmem:[%s3146_s4 + $0x14] sm:$0xf] (!%p201_p9)  ;;  %v2052_v19 = vld [vmem:[%s3146_s4 + $0x18] sm:$0xf] (!%p201_p9) }
  0x13   : > { %v2053_v20 = vld [vmem:[%s3146_s4 + $0x1c] sm:$0xf] (!%p201_p9)  ;;  %s2246_s17 = smov (!%p201_p9), 15   ;;  %v2054_v21 = vld [vmem:[%s3144_s2 + $0x20] sm:$0xf] (!%p201_p9)  ;;  %s2247_s25 = smov (!%p201_p9), 1  }
  0x14   : > { %v2055_v22 = vld [vmem:[%s3144_s2 + $0x24] sm:$0xf] (!%p201_p9)  ;;  %v2056_v23 = vld [vmem:[%s3144_s2 + $0x28] sm:$0xf] (!%p201_p9)  ;;  %v2057_v24 = vld [vmem:[%s3144_s2 + $0x2c] sm:$0xf] (!%p201_p9) }
  0x15   : > { %s234_s30 = scalar_select %p233_p10, %s2304_s22, 1  ;;  %v2058_v25 = vld [vmem:[%s3146_s4 + $0x20] sm:$0xf]  ;;  %v2059_v26 = vld [vmem:[%s3146_s4 + $0x24] sm:$0xf]  ;;  %v2512_v53 = vand.u32 127, %v245_v49 }
  0x16   : > { %v2060_v27 = vld [vmem:[%s3146_s4 + $0x28] sm:$0xf]  ;;  %v2061_v28 = vld [vmem:[%s3146_s4 + $0x2c] sm:$0xf]  ;;  %v2062_v29 = vld [vmem:[%s3144_s2 + $0x30] sm:$0xf] }
  0x17   : > { %s2115_s6 = sshll.u32 %s234_s30, 3  ;;  %v2063_v30 = vld [vmem:[%s3144_s2 + $0x34] sm:$0xf]  ;;  %v2064_v31 = vld [vmem:[%s3144_s2 + $0x38] sm:$0xf]  ;;  %v2521_v57 = vadd.s32 128, %v2512_v53 }
  0x18   : > { %s2336_s9 = scalar_lea.vmem %s3143_s1, %s2115_s6  ;;  %s237_s12 = scalar_lea.vmem %s3142_s0, %s2115_s6  ;;  %v2065_v32 = vld [vmem:[%s3144_s2 + $0x3c] sm:$0xf]  ;;  %v2066_v33 = vld [vmem:[%s3146_s4 + $0x30] sm:$0xf]  ;;  %v2067_v34 = vld [vmem:[%s3146_s4 + $0x34] sm:$0xf] }
  0x19   : > { %v2342_v1 = vld [vmem:[%s2336_s9] sm:$0xff]  ;;  %v2068_v35 = vld [vmem:[%s3146_s4 + $0x38] sm:$0xf]  ;;  %v2069_v36 = vld [vmem:[%s3146_s4 + $0x3c] sm:$0xf]  ;;  %s2248_s6 = smov 127  }
  0x1a   : > { %v2344_v2 = vld [vmem:[%s237_s12] sm:$0xff]  ;;  %285 = vrot.lane.b32.xlu1 %v2342_v1, %s2244_s13  ;;  %v2358_v5 = vcombine.high %v2342_v1, %v2342_v1  ;;  %v2072_v39 = vld [vmem:[%s3144_s2 + $0x48] sm:$0xf]  ;;  %v2073_v40 = vld [vmem:[%s3144_s2 + $0x4c] sm:$0xf]  ;;  %v252_v58 = vand.u32 15, %v2512_v53 }
  0x1b   : > { %275 = vrot.lane.b32.xlu0 %v2344_v2, %s2244_s13  ;;  %v2350_v3 = vcombine.high %v2344_v2, %v2344_v2  ;;  %v2070_v37 = vld [vmem:[%s3144_s2 + $0x40] sm:$0xf]  ;;  %v2071_v38 = vld [vmem:[%s3144_s2 + $0x44] sm:$0xf]  ;;  %v2076_v43 = vld [vmem:[%s3146_s4 + $0x48] sm:$0xf] }
  0x1c   : > { %v2074_v41 = vld [vmem:[%s3146_s4 + $0x40] sm:$0xf]  ;;  %v2075_v42 = vld [vmem:[%s3146_s4 + $0x44] sm:$0xf]  ;;  %v2077_v44 = vld [vmem:[%s3146_s4 + $0x4c] sm:$0xf] }
  0x1d   : > { %v2078_v45 = vld [vmem:[%s3144_s2 + $0x50] sm:$0xf]  ;;  %v2079_v46 = vld [vmem:[%s3144_s2 + $0x54] sm:$0xf]  ;;  %v2080_v47 = vld [vmem:[%s3144_s2 + $0x58] sm:$0xf] }
  0x1e   : > { %327 = vperm.xlu1 %2167, %v2040_v4   ;;  %v2081_v48 = vld [vmem:[%s3144_s2 + $0x5c] sm:$0xf]  ;;  %v2082_v51 = vld [vmem:[%s3146_s4 + $0x50] sm:$0xf]  ;;  %v2083_v52 = vld [vmem:[%s3146_s4 + $0x54] sm:$0xf] }
  0x1f   : > { %277 = vrot.lane.b32.xlu0 %v2350_v3, %s2244_s13  ;;  %v2084_v55 = vld [vmem:[%s3146_s4 + $0x58] sm:$0xf]  ;;  %v2085_v56 = vld [vmem:[%s3146_s4 + $0x5c] sm:$0xf]  ;;  %v2090_v61 = vld [vmem:[%s3146_s4 + $0x60] sm:$0xf] }
  0x20   : > { %v259_v62 = vand.u32 15, %v2521_v57  ;;  %v2091_v63 = vld [vmem:[%s3146_s4 + $0x64] sm:$0xf]  ;;  %vm279_vm0 = vcmp.lt.s32.totalorder %v2512_v53, 17  ;;  %vm291_vm1 = vcmp.ge.s32.totalorder %v2512_v53, 16  ;;  %vm2537_vm2 = vcmp.ge.s32.totalorder %v252_v58, 1 }
  0x21   : > { %vm2557_vm4 = vmand %vm291_vm1, %vm2537_vm2  ;;  %vm459_vm5 = vcmp.lt.s32.totalorder %v2512_v53, 16  ;;  %vm632_vm6 = vcmp.lt.s32.totalorder %v2512_v53, 15  ;;  %vm2715_vm7 = vcmp.lt.s32.totalorder %v252_v58, 15  ;;  %vm809_vm10 = vcmp.lt.s32.totalorder %v2512_v53, 1  ;;  %s2117_s30 = sshll.u32 %s2304_s22, 7  ;;  %s2252_s22 = smov [#allocation2]  }
  0x22   : > { %287 = vrot.lane.b32.xlu1 %v2358_v5, %s2244_s13  ;;  %vm2549_vm3 = vcmp.ge.s32.totalorder %v259_v62, 1  ;;  %s2249_s13 = smov 113   ;;  %vm2721_vm8 = vcmp.lt.s32.totalorder %v259_v62, 15  ;;  %vm2733_vm9 = vmand %vm291_vm1, %vm2715_vm7  ;;  %vm1214_vm11 = vcmp.lt.s32.totalorder %v2512_v53, 127  ;;  %vm1397_vm12 = vcmp.lt.s32.totalorder %v2521_v57, 240  ;;  %s3100_s11 = scalar_lea.hbm %s3147_s5, %s2117_s30 }
  0x23   : > { %308 = vperm.xlu0 %2166, %v305_v6   ;;  %vm1387_vm13 = vcmp.lt.s32.totalorder %v2512_v53, 113  ;;  %vm2977_vm14 = vmand %vm1397_vm12, %vm2549_vm3  ;;  %vm1564_vm15 = vcmp.lt.s32.totalorder %v2512_v53, 112 }
  0x26   : > { %346 = vperm.xlu1 %2167, %v2041_v7   ;;  %v2541_v7 = vshrl.u32 %v245_v49, 7 }
  0x27   : > { %365 = vperm.xlu0 %2166, %v2042_v8  }
  0x2a   : > { %383 = vperm.xlu1 %2167, %v380_v9  }
  0x2b   : > { %402 = vperm.xlu0 %2166, %v2043_v10  }
  0x2e   : > { %421 = vperm.xlu1 %2167, %v2044_v11  }
  0x2f   : > { %440 = vperm.xlu0 %2166, %v2045_v12  }
  0x32   : > { %455 = vrot.lane.b32.xlu1 %v2344_v2, %s2245_s15 }
  0x33   : > { %457 = vrot.lane.b32.xlu0 %v2350_v3, %s2245_s15 }
  0x36   : > { %462 = vrot.lane.b32.xlu1 %v2342_v1, %s2245_s15 }
  0x37   : > { %464 = vrot.lane.b32.xlu0 %v2358_v5, %s2245_s15  ;;  %s2183_s15 = sshll.u32 %s2252_s22, 4  ;;  %s2184_s15 = int_to_ptr.vmem [resolvable:$false] %s2183_s15 }
  0x38   : > { %s2185_s16 = scalar_lea.vmem %s2184_s15, 256 }
  0x3a   : > { %480 = vperm.xlu1 %2167, %v2046_v13  }
  0x3b   : > { %499 = vperm.xlu0 %2166, %v2047_v14  }
  0x3e   : > { %518 = vperm.xlu1 %2167, %v2048_v15  }
  0x3f   : > { %537 = vperm.xlu0 %2166, %v2049_v16  }
  0x42   : > { %556 = vperm.xlu1 %2167, %v2050_v17  }
  0x43   : > { %575 = vperm.xlu0 %2166, %v2051_v18   ;;  %v2572_v18 = vsub.s32 0, %v2541_v7 }
  0x46   : > { %594 = vperm.xlu1 %2167, %v2052_v19   ;;  %v2577_v19 = vsub.s32 1, %v2541_v7 }
  0x47   : > { %613 = vperm.xlu0 %2166, %v2053_v20   ;;  %v2092_v20 = vld [vmem:[%s3146_s4 + $0x68] sm:$0xf] }
  0x4a   : > { %628 = vrot.lane.b32.xlu1 %v2344_v2, %s2246_s17 }
  0x4b   : > { %630 = vrot.lane.b32.xlu0 %v2350_v3, %s2246_s17 }
  0x4e   : > { %635 = vrot.lane.b32.xlu1 %v2342_v1, %s2246_s17 }
  0x4f   : > { %637 = vrot.lane.b32.xlu0 %v2358_v5, %s2246_s17  ;;  %s2251_s17 = smov 111  }
  0x52   : > { %657 = vperm.xlu1 %2167, %v2054_v21  }
  0x53   : > { %676 = vperm.xlu0 %2166, %v2055_v22  }
  0x56   : > { %695 = vperm.xlu1 %2167, %v2056_v23   ;;  %v2093_v23 = vld [vmem:[%s3146_s4 + $0x6c] sm:$0xf] }
  0x57   : > { %714 = vperm.xlu0 %2166, %v2057_v24  }
  0x5a   : > { %733 = vperm.xlu1 %2167, %v2058_v25  }
  0x5b   : > { %752 = vperm.xlu0 %2166, %v2059_v26  }
  0x5e   : > { %771 = vperm.xlu1 %2167, %v2060_v27  }
  0x5f   : > { %790 = vperm.xlu0 %2166, %v2061_v28  }
  0x62   : > { %805 = vrot.lane.b32.xlu1 %v2344_v2, %s2247_s25 }
  0x63   : > { %807 = vrot.lane.b32.xlu0 %v2350_v3, %s2247_s25 }
  0x66   : > { %812 = vrot.lane.b32.xlu1 %v2342_v1, %s2247_s25 }
  0x67   : > { %814 = vrot.lane.b32.xlu0 %v2358_v5, %s2247_s25 }
  0x6a   : > { %830 = vperm.xlu1 %2167, %v2062_v29  }
  0x6b   : > { %849 = vperm.xlu0 %2166, %v2063_v30   ;;  %v2600_v30 = vsub.s32 2, %v2541_v7 }
  0x6e   : > { %868 = vperm.xlu1 %2167, %v2064_v31  }
  0x6f   : > { %887 = vperm.xlu0 %2166, %v2065_v32  }
  0x72   : > { %906 = vperm.xlu1 %2167, %v2066_v33   ;;  %v2603_v33 = vsub.s32 3, %v2541_v7 }
  0x73   : > { %925 = vperm.xlu0 %2166, %v2067_v34  }
  0x76   : > { %944 = vperm.xlu1 %2167, %v2068_v35  }
  0x77   : > { %963 = vperm.xlu0 %2166, %v2069_v36   ;;  %v2098_v36 = vld [vmem:[%s3146_s4 + $0x70] sm:$0xf] }
  0x7a   : > { %982 = vperm.xlu1 %2167, %v2070_v37  }
  0x7b   : > { %1011 = vperm.xlu0 %2166, %v2071_v38  }
  0x7e   : > { %1040 = vperm.xlu1 %2167, %v2072_v39  }
  0x7f   : > { %1069 = vperm.xlu0 %2166, %v2073_v40  }
  0x82   : > { %1098 = vperm.xlu1 %2167, %v2074_v41   ;;  %v2099_v41 = vld [vmem:[%s3146_s4 + $0x74] sm:$0xf] }
  0x83   : > { %1127 = vperm.xlu0 %2166, %v2075_v42  }
  0x86   : > { %1156 = vperm.xlu1 %2167, %v2076_v43  }
  0x87   : > { %1185 = vperm.xlu0 %2166, %v2077_v44  }
  0x8a   : > { %1210 = vrot.lane.b32.xlu1 %v2344_v2, %s2248_s6 }
  0x8b   : > { %1212 = vrot.lane.b32.xlu0 %v2350_v3, %s2248_s6 }
  0x8c   : > { %v286_v54 = vpop.permute.xlu1 %285 }
  0x8d   : > { %v276_v50 = vpop.permute.xlu0 %275 }
  0x8e   : > { %1217 = vrot.lane.b32.xlu1 %v2342_v1, %s2248_s6 }
  0x8f   : > { %1219 = vrot.lane.b32.xlu0 %v2358_v5, %s2248_s6  ;;  %s2250_s6 = smov 112  }
  0x91   : > { %v278_v59 = vpop.permute.xlu0 %277 }
  0x92   : > { %1235 = vperm.xlu1 %2167, %v2078_v45   ;;  %v280_v16 = vsel %vm279_vm0, %v276_v50, %v278_v59  ;;  %v281_v17 = vsel %vm279_vm0, %v278_v59, %v276_v50 }
  0x93   : > { %1254 = vperm.xlu0 %2166, %v2079_v46   ;;  %v2591_v24 = vsel %vm2557_vm4, %v281_v17, 0.0  ;;  %v2595_v25 = vsel %vm2549_vm3, %v280_v16, 0.0 }
  0x94   : > { %v333_v37 = vrot.slane %v2591_v24, %v2577_v19  ;;  %v337_v38 = vrot.slane %v2595_v25, %v2577_v19  ;;  %v314_v42 = vrot.slane %v2591_v24, %v2572_v18  ;;  %v318_v43 = vrot.slane %v2595_v25, %v2572_v18 }
  0x96   : > { %1273 = vperm.xlu1 %2167, %v2080_v47  }
  0x97   : > { %1292 = vperm.xlu0 %2166, %v2081_v48  }
  0x9a   : > { %1311 = vperm.xlu1 %2167, %v2082_v51  }
  0x9b   : > { %1330 = vperm.xlu0 %2166, %v2083_v52  }
  0x9d   : > { %v2524_v60 = vpop.permute.xlu1 %327 }
  0x9e   : > { %1349 = vperm.xlu1 %2167, %v2084_v55   ;;  %v352_v55 = vrot.slane %v2591_v24, %v2600_v30 }
  0x9f   : > { %1368 = vperm.xlu0 %2166, %v2085_v56   ;;  %v356_v56 = vrot.slane %v2595_v25, %v2600_v30 }
  0xa1   : > { %v288_v4 = vpop.permute.xlu1 %287 }
  0xa2   : > { %v309_v6 = vpop.permute.xlu0 %308  ;;  %v289_v8 = vsel %vm279_vm0, %v286_v54, %v288_v4  ;;  %v290_v9 = vsel %vm279_vm0, %v288_v4, %v286_v54  ;;  %1488 = vperm.xlu1 %2167, %v2090_v61   ;;  %vm1737_vm0 = vcmp.lt.s32.totalorder %v2512_v53, 111 }
  0xa3   : > { %1507 = vperm.xlu0 %2166, %v2091_v63   ;;  %v303_v12 = vsel %vm2557_vm4, %v290_v9, 0.0  ;;  %v304_v13 = vsel %vm2549_vm3, %v289_v8, 0.0  ;;  %v319_v52 = vmul.f32 %v314_v42, %v309_v6  ;;  %v320_v54 = vmul.f32 %v318_v43, %v309_v6  ;;  %v2107_v42 = vld [vmem:[%s3146_s4 + $0x84] sm:$0xf] }
  0xa4   : > { %v389_v21 = vrot.slane %v303_v12, %v2572_v18  ;;  %v393_v22 = vrot.slane %v304_v13, %v2572_v18  ;;  %v408_v27 = vrot.slane %v303_v12, %v2577_v19  ;;  %v412_v28 = vrot.slane %v304_v13, %v2577_v19 }
  0xa5   : > { %v347_v14 = vpop.permute.xlu1 %346  ;;  %v427_v39 = vrot.slane %v303_v12, %v2600_v30  ;;  %v431_v40 = vrot.slane %v304_v13, %v2600_v30  ;;  %v446_v50 = vrot.slane %v303_v12, %v2603_v33  ;;  %v450_v51 = vrot.slane %v304_v13, %v2603_v33 }
  0xa6   : > { %v2565_v15 = vpop.permute.xlu0 %365  ;;  %1390 = vrot.lane.b32.xlu1 %v2342_v1, %s2249_s13  ;;  %v338_v8 = vmul.f32 %v333_v37, %v2524_v60  ;;  %v339_v9 = vmul.f32 %v337_v38, %v2524_v60  ;;  %v357_v11 = vmul.f32 %v352_v55, %v347_v14  ;;  %v358_v12 = vmul.f32 %v356_v56, %v347_v14  ;;  %v2100_v14 = vld [vmem:[%s3146_s4 + $0x78] sm:$0xf] }
  0xa7   : > { %1392 = vrot.lane.b32.xlu0 %v2358_v5, %s2249_s13 }
  0xa8   : > { %v341_v60 = vadd.f32 %v339_v9, %v320_v54 }
  0xa9   : > { %v384_v26 = vpop.permute.xlu1 %383 }
  0xaa   : > { %v403_v29 = vpop.permute.xlu0 %402  ;;  %v394_v31 = vmul.f32 %v389_v21, %v384_v26  ;;  %v395_v32 = vmul.f32 %v393_v22, %v384_v26  ;;  %1526 = vperm.xlu1 %2167, %v2092_v20   ;;  %v340_v22 = vadd.f32 %v338_v8, %v319_v52  ;;  %v2101_v26 = vld [vmem:[%s3146_s4 + $0x7c] sm:$0xf] }
  0xab   : > { %v413_v34 = vmul.f32 %v408_v27, %v403_v29  ;;  %v414_v35 = vmul.f32 %v412_v28, %v403_v29  ;;  %1545 = vperm.xlu0 %2166, %v2093_v23   ;;  %v371_v23 = vrot.slane %v2591_v24, %v2603_v33  ;;  %v360_v28 = vadd.f32 %v358_v12, %v341_v60 }
  0xac   : > { %v359_v27 = vadd.f32 %v357_v11, %v340_v22  ;;  %v375_v29 = vrot.slane %v2595_v25, %v2603_v33  ;;  %v2106_v25 = vld [vmem:[%s3146_s4 + $0x80] sm:$0xf] }
  0xad   : > { %v415_v44 = vadd.f32 %v413_v34, %v394_v31  ;;  %v416_v45 = vadd.f32 %v414_v35, %v395_v32  ;;  %v422_v46 = vpop.permute.xlu1 %421 }
  0xae   : > { %v441_v47 = vpop.permute.xlu0 %440  ;;  %v432_v48 = vmul.f32 %v427_v39, %v422_v46  ;;  %v433_v49 = vmul.f32 %v431_v40, %v422_v46  ;;  %1661 = vperm.xlu1 %2167, %v2098_v36   ;;  %v376_v36 = vmul.f32 %v371_v23, %v2565_v15  ;;  %v377_v37 = vmul.f32 %v375_v29, %v2565_v15 }
  0xaf   : > { %1680 = vperm.xlu0 %2166, %v2099_v41   ;;  %v451_v63 = vmul.f32 %v446_v50, %v441_v47  ;;  %v452_v4 = vmul.f32 %v450_v51, %v441_v47 }
  0xb0   : > { %v434_v59 = vadd.f32 %v432_v48, %v415_v44  ;;  %v435_v61 = vadd.f32 %v433_v49, %v416_v45  ;;  %v378_v43 = vadd.f32 %v376_v36, %v359_v27  ;;  %v379_v44 = vadd.f32 %v377_v37, %v360_v28  ;;  %v2086_v36 = vld [vmem:[%s3144_s2 + $0x60] sm:$0xf] }
  0xb1   : > { %v456_v13 = vpop.permute.xlu1 %455 }
  0xb2   : > { %v458_v16 = vpop.permute.xlu0 %457  ;;  %v2630_v6 = vadd.f32 %v451_v63, %v434_v59  ;;  %v2632_v17 = vadd.f32 %v452_v4, %v435_v61  ;;  %1567 = vrot.lane.b32.xlu1 %v2342_v1, %s2250_s6 }
  0xb3   : > { %v460_v20 = vsel %vm459_vm5, %v456_v13, %v458_v16  ;;  %v461_v21 = vsel %vm459_vm5, %v458_v16, %v456_v13  ;;  %1569 = vrot.lane.b32.xlu0 %v2358_v5, %s2250_s6  ;;  %v2108_v16 = vld [vmem:[%s3146_s4 + $0x88] sm:$0xf] }
  0xb4   : > { %v472_v31 = vsel %vm291_vm1, %v461_v21, 0.0  ;;  %v490_v39 = vrot.slane %v460_v20, %v2572_v18  ;;  %v509_v41 = vrot.slane %v460_v20, %v2577_v19  ;;  %v528_v54 = vrot.slane %v460_v20, %v2600_v30 }
  0xb5   : > { %v463_v32 = vpop.permute.xlu1 %462  ;;  %v486_v38 = vrot.slane %v472_v31, %v2572_v18  ;;  %v505_v40 = vrot.slane %v472_v31, %v2577_v19  ;;  %v524_v52 = vrot.slane %v472_v31, %v2600_v30  ;;  %v543_v59 = vrot.slane %v472_v31, %v2603_v33 }
  0xb6   : > { %v465_v34 = vpop.permute.xlu0 %464  ;;  %1699 = vperm.xlu1 %2167, %v2100_v14   ;;  %v547_v61 = vrot.slane %v460_v20, %v2603_v33  ;;  %v2109_v14 = vld [vmem:[%s3146_s4 + $0x8c] sm:$0xf] }
  0xb7   : > { %v2656_v35 = vsel %vm459_vm5, %v463_v32, %v465_v34  ;;  %v467_v24 = vsel %vm459_vm5, %v465_v34, %v463_v32  ;;  %1718 = vperm.xlu0 %2166, %v2101_v26  }
  0xb8   : > { %v474_v55 = vsel %vm291_vm1, %v467_v24, 0.0  ;;  %v566_v60 = vrot.slane %v2656_v35, %v2572_v18  ;;  %vm3019_vm1 = vmand %vm1397_vm12, %vm2721_vm8 }
  0xb9   : > { %v481_v15 = vpop.permute.xlu1 %480  ;;  %v562_v22 = vrot.slane %v474_v55, %v2572_v18  ;;  %v581_v26 = vrot.slane %v474_v55, %v2577_v19 }
  0xba   : > { %v500_v45 = vpop.permute.xlu0 %499  ;;  %v491_v46 = vmul.f32 %v486_v38, %v481_v15  ;;  %v492_v47 = vmul.f32 %v490_v39, %v481_v15  ;;  %1836 = vperm.xlu1 %2167, %v2106_v25   ;;  %v600_v38 = vrot.slane %v474_v55, %v2600_v30  ;;  %v604_v39 = vrot.slane %v2656_v35, %v2600_v30 }
  0xbb   : > { %v510_v48 = vmul.f32 %v505_v40, %v500_v45  ;;  %v511_v49 = vmul.f32 %v509_v41, %v500_v45  ;;  %1855 = vperm.xlu0 %2166, %v2107_v42   ;;  %v2087_v40 = vld [vmem:[%s3144_s2 + $0x64] sm:$0xf]  ;;  %v619_v42 = vrot.slane %v474_v55, %v2603_v33 }
  0xbc   : > { %v493_v50 = vadd.f32 %v491_v46, %v378_v43  ;;  %v494_v51 = vadd.f32 %v492_v47, %v379_v44  ;;  %v623_v43 = vrot.slane %v2656_v35, %v2603_v33 }
  0xbd   : > { %v519_v56 = vpop.permute.xlu1 %518 }
  0xbe   : > { %v538_v63 = vpop.permute.xlu0 %537  ;;  %v512_v4 = vadd.f32 %v510_v48, %v493_v50  ;;  %v513_v8 = vadd.f32 %v511_v49, %v494_v51  ;;  %v529_v9 = vmul.f32 %v524_v52, %v519_v56  ;;  %v530_v11 = vmul.f32 %v528_v54, %v519_v56  ;;  %1740 = vrot.lane.b32.xlu1 %v2342_v1, %s2251_s17 }
  0xbf   : > { %v548_v12 = vmul.f32 %v543_v59, %v538_v63  ;;  %v549_v13 = vmul.f32 %v547_v61, %v538_v63  ;;  %1742 = vrot.lane.b32.xlu0 %v2358_v5, %s2251_s17  ;;  %v585_v5 = vrot.slane %v2656_v35, %v2577_v19  ;;  %v2088_v59 = vld [vmem:[%s3144_s2 + $0x68] sm:$0xf]  ;;  %v2089_v61 = vld [vmem:[%s3144_s2 + $0x6c] sm:$0xf] }
  0xc0   : > { %v531_v21 = vadd.f32 %v529_v9, %v512_v4  ;;  %v532_v20 = vadd.f32 %v530_v11, %v513_v8 }
  0xc1   : > { %v557_v23 = vpop.permute.xlu1 %556 }
  0xc2   : > { %v576_v27 = vpop.permute.xlu0 %575  ;;  %v2694_v28 = vadd.f32 %v548_v12, %v531_v21  ;;  %v2696_v29 = vadd.f32 %v549_v13, %v532_v20  ;;  %v567_v31 = vmul.f32 %v562_v22, %v557_v23  ;;  %v568_v32 = vmul.f32 %v566_v60, %v557_v23  ;;  %1874 = vperm.xlu1 %2167, %v2108_v16   ;;  %v2094_v13 = vld [vmem:[%s3144_s2 + $0x70] sm:$0xf]  ;;  %v2095_v60 = vld [vmem:[%s3144_s2 + $0x74] sm:$0xf] }
  0xc3   : > { %v586_v34 = vmul.f32 %v581_v26, %v576_v27  ;;  %v587_v24 = vmul.f32 %v585_v5, %v576_v27  ;;  %1893 = vperm.xlu0 %2166, %v2109_v14  }
  0xc4   : > { %v569_v37 = vadd.f32 %v567_v31, %v2630_v6  ;;  %v570_v25 = vadd.f32 %v568_v32, %v2632_v17 }
  0xc5   : > { %v595_v41 = vpop.permute.xlu1 %594 }
  0xc6   : > { %v614_v44 = vpop.permute.xlu0 %613  ;;  %v588_v15 = vadd.f32 %v586_v34, %v569_v37  ;;  %v589_v6 = vadd.f32 %v587_v24, %v570_v25  ;;  %v605_v45 = vmul.f32 %v600_v38, %v595_v41  ;;  %v606_v17 = vmul.f32 %v604_v39, %v595_v41  ;;  %1412 = vperm.xlu1 %2167, %v2086_v36  }
  0xc7   : > { %v624_v46 = vmul.f32 %v619_v42, %v614_v44  ;;  %v625_v47 = vmul.f32 %v623_v43, %v614_v44  ;;  %1431 = vperm.xlu0 %2166, %v2087_v40  }
  0xc8   : > { %v607_v49 = vadd.f32 %v605_v45, %v588_v15  ;;  %v608_v50 = vadd.f32 %v606_v17, %v589_v6  ;;  %v2096_v6 = vld [vmem:[%s3144_s2 + $0x78] sm:$0xf] }
  0xc9   : > { %v629_v35 = vpop.permute.xlu1 %628 }
  0xca   : > { %v631_v52 = vpop.permute.xlu0 %630  ;;  %v2725_v54 = vadd.f32 %v624_v46, %v607_v49  ;;  %v2727_v55 = vadd.f32 %v625_v47, %v608_v50  ;;  %1383 = vrot.lane.b32.xlu1 %v2344_v2, %s2249_s13  ;;  %v2097_v49 = vld [vmem:[%s3144_s2 + $0x7c] sm:$0xf] }
  0xcb   : > { %v633_v56 = vsel %vm632_vm6, %v629_v35, %v631_v52  ;;  %v634_v62 = vsel %vm632_vm6, %v631_v52, %v629_v35  ;;  %1385 = vrot.lane.b32.xlu0 %v2350_v3, %s2249_s13 }
  0xcc   : > { %v649_v63 = vsel %vm2733_vm9, %v634_v62, 0.0  ;;  %v650_v4 = vsel %vm2721_vm8, %v633_v56, 0.0 }
  0xcd   : > { %v636_v8 = vpop.permute.xlu1 %635  ;;  %v663_v16 = vrot.slane %v649_v63, %v2572_v18  ;;  %v667_v21 = vrot.slane %v650_v4, %v2572_v18  ;;  %v682_v20 = vrot.slane %v649_v63, %v2577_v19  ;;  %v686_v22 = vrot.slane %v650_v4, %v2577_v19 }
  0xce   : > { %v638_v9 = vpop.permute.xlu0 %637  ;;  %1450 = vperm.xlu1 %2167, %v2088_v59   ;;  %v701_v24 = vrot.slane %v649_v63, %v2600_v30  ;;  %v705_v36 = vrot.slane %v650_v4, %v2600_v30  ;;  %v720_v39 = vrot.slane %v649_v63, %v2603_v33  ;;  %v724_v40 = vrot.slane %v650_v4, %v2603_v33 }
  0xcf   : > { %v639_v11 = vsel %vm632_vm6, %v636_v8, %v638_v9  ;;  %v640_v12 = vsel %vm632_vm6, %v638_v9, %v636_v8  ;;  %1469 = vperm.xlu0 %2166, %v2089_v61   ;;  %v2102_v8 = vld [vmem:[%s3144_s2 + $0x80] sm:$0xf] }
  0xd0   : > { %v651_v37 = vsel %vm2733_vm9, %v640_v12, 0.0  ;;  %v652_v25 = vsel %vm2721_vm8, %v639_v11, 0.0 }
  0xd1   : > { %v658_v14 = vpop.permute.xlu1 %657  ;;  %v739_v46 = vrot.slane %v651_v37, %v2572_v18  ;;  %v743_v47 = vrot.slane %v652_v25, %v2572_v18  ;;  %v758_v35 = vrot.slane %v651_v37, %v2577_v19  ;;  %v762_v52 = vrot.slane %v652_v25, %v2577_v19 }
  0xd2   : > { %v677_v23 = vpop.permute.xlu0 %676  ;;  %v668_v26 = vmul.f32 %v663_v16, %v658_v14  ;;  %v669_v5 = vmul.f32 %v667_v21, %v658_v14  ;;  %1585 = vperm.xlu1 %2167, %v2094_v13   ;;  %v777_v63 = vrot.slane %v651_v37, %v2600_v30  ;;  %v781_v4 = vrot.slane %v652_v25, %v2600_v30  ;;  %v2103_v16 = vld [vmem:[%s3144_s2 + $0x84] sm:$0xf] }
  0xd3   : > { %v687_v27 = vmul.f32 %v682_v20, %v677_v23  ;;  %v688_v31 = vmul.f32 %v686_v22, %v677_v23  ;;  %1604 = vperm.xlu0 %2166, %v2095_v60   ;;  %v796_v20 = vrot.slane %v651_v37, %v2603_v33  ;;  %v800_v22 = vrot.slane %v652_v25, %v2603_v33 }
  0xd4   : > { %v670_v32 = vadd.f32 %v668_v26, %v2694_v28  ;;  %v671_v34 = vadd.f32 %v669_v5, %v2696_v29 }
  0xd5   : > { %v696_v38 = vpop.permute.xlu1 %695 }
  0xd6   : > { %v715_v41 = vpop.permute.xlu0 %714  ;;  %v689_v42 = vadd.f32 %v687_v27, %v670_v32  ;;  %v690_v28 = vadd.f32 %v688_v31, %v671_v34  ;;  %v706_v43 = vmul.f32 %v701_v24, %v696_v38  ;;  %v707_v29 = vmul.f32 %v705_v36, %v696_v38  ;;  %1560 = vrot.lane.b32.xlu1 %v2344_v2, %s2250_s6  ;;  %v2104_v38 = vld [vmem:[%s3144_s2 + $0x88] sm:$0xf] }
  0xd7   : > { %v725_v44 = vmul.f32 %v720_v39, %v715_v41  ;;  %v726_v15 = vmul.f32 %v724_v40, %v715_v41  ;;  %1562 = vrot.lane.b32.xlu0 %v2350_v3, %s2250_s6  ;;  %v2105_v39 = vld [vmem:[%s3144_s2 + $0x8c] sm:$0xf] }
  0xd8   : > { %v708_v45 = vadd.f32 %v706_v43, %v689_v42  ;;  %v709_v17 = vadd.f32 %v707_v29, %v690_v28 }
  0xd9   : > { %v734_v50 = vpop.permute.xlu1 %733 }
  0xda   : > { %v753_v58 = vpop.permute.xlu0 %752  ;;  %v727_v56 = vadd.f32 %v725_v44, %v708_v45  ;;  %v728_v62 = vadd.f32 %v726_v15, %v709_v17  ;;  %v744_v59 = vmul.f32 %v739_v46, %v734_v50  ;;  %v745_v61 = vmul.f32 %v743_v47, %v734_v50  ;;  %1623 = vperm.xlu1 %2167, %v2096_v6  }
  0xdb   : > { %1642 = vperm.xlu0 %2166, %v2097_v49   ;;  %v763_v12 = vmul.f32 %v758_v35, %v753_v58  ;;  %v764_v13 = vmul.f32 %v762_v52, %v753_v58 }
  0xdc   : > { %v746_v9 = vadd.f32 %v744_v59, %v2725_v54  ;;  %v747_v11 = vadd.f32 %v745_v61, %v2727_v55 }
  0xdd   : > { %v772_v21 = vpop.permute.xlu1 %771 }
  0xde   : > { %v791_v60 = vpop.permute.xlu0 %790  ;;  %v765_v14 = vadd.f32 %v763_v12, %v746_v9  ;;  %v766_v23 = vadd.f32 %v764_v13, %v747_v11  ;;  %v782_v26 = vmul.f32 %v777_v63, %v772_v21  ;;  %v783_v5 = vmul.f32 %v781_v4, %v772_v21  ;;  %1760 = vperm.xlu1 %2167, %v2102_v8  }
  0xdf   : > { %1779 = vperm.xlu0 %2166, %v2103_v16   ;;  %v801_v27 = vmul.f32 %v796_v20, %v791_v60  ;;  %v802_v31 = vmul.f32 %v800_v22, %v791_v60  ;;  %v991_v8 = vsub.s32 4, %v2541_v7  ;;  %v1020_v20 = vsub.s32 5, %v2541_v7 }
  0xe0   : > { %v784_v54 = vadd.f32 %v782_v26, %v765_v14  ;;  %v785_v55 = vadd.f32 %v783_v5, %v766_v23  ;;  %v988_v14 = vrot.slane %v2344_v2, %v2572_v18 }
  0xe1   : > { %v806_v32 = vpop.permute.xlu1 %805  ;;  %v992_v23 = vrot.slane %v2344_v2, %v991_v8 }
  0xe2   : > { %v808_v34 = vpop.permute.xlu0 %807  ;;  %v2806_v24 = vadd.f32 %v801_v27, %v784_v54  ;;  %v2808_v36 = vadd.f32 %v802_v31, %v785_v55  ;;  %1733 = vrot.lane.b32.xlu1 %v2344_v2, %s2251_s17  ;;  %v1049_v54 = vsub.s32 6, %v2541_v7  ;;  %v1078_v31 = vsub.s32 7, %v2541_v7 }
  0xe3   : > { %v810_v37 = vsel %vm809_vm10, %v806_v32, %v808_v34  ;;  %v811_v25 = vsel %vm809_vm10, %v808_v34, %v806_v32  ;;  %1735 = vrot.lane.b32.xlu0 %v2350_v3, %s2251_s17  ;;  %v1908_v3 = vld [vmem:[%s3145_s3] sm:$0xf]  ;;  %v1017_v32 = vrot.slane %v2344_v2, %v2577_v19  ;;  %v1021_v34 = vrot.slane %v2344_v2, %v1020_v20 }
  0xe4   : > { %v822_v40 = vsel %vm2537_vm2, %v811_v25, 0.0  ;;  %v823_v41 = vsel %vm2549_vm3, %v810_v37, 0.0 }
  0xe5   : > { %v813_v42 = vpop.permute.xlu1 %812  ;;  %v836_v43 = vrot.slane %v822_v40, %v2572_v18  ;;  %v840_v29 = vrot.slane %v823_v41, %v2572_v18  ;;  %v855_v44 = vrot.slane %v822_v40, %v2577_v19  ;;  %v859_v15 = vrot.slane %v823_v41, %v2577_v19 }
  0xe6   : > { %v815_v28 = vpop.permute.xlu0 %814  ;;  %1798 = vperm.xlu1 %2167, %v2104_v38   ;;  %v874_v52 = vrot.slane %v822_v40, %v2600_v30  ;;  %v878_v58 = vrot.slane %v823_v41, %v2600_v30  ;;  %v893_v61 = vrot.slane %v822_v40, %v2603_v33  ;;  %v897_v63 = vrot.slane %v823_v41, %v2603_v33 }
  0xe7   : > { %1817 = vperm.xlu0 %2166, %v2105_v39   ;;  %v816_v55 = vsel %vm809_vm10, %v813_v42, %v815_v28  ;;  %v817_v27 = vsel %vm809_vm10, %v815_v28, %v813_v42  ;;  %v998_v38 = vrot.slane %v988_v14, %v2572_v18  ;;  %v1002_v39 = vrot.slane %v992_v23, %v2572_v18 }
  0xe8   : > { %v2861_v40 = vsel %vm2537_vm2, %v817_v27, 0.0  ;;  %v2865_v41 = vsel %vm2549_vm3, %v816_v55, 0.0  ;;  %v1046_v42 = vrot.slane %v2344_v2, %v2600_v30  ;;  %v1050_v28 = vrot.slane %v2344_v2, %v1049_v54 }
  0xe9   : > { %v831_v6 = vpop.permute.xlu1 %830  ;;  %v931_v23 = vrot.slane %v2861_v40, %v2577_v19 }
  0xea   : > { %v850_v45 = vpop.permute.xlu0 %849  ;;  %v841_v17 = vmul.f32 %v836_v43, %v831_v6  ;;  %v842_v46 = vmul.f32 %v840_v29, %v831_v6  ;;  %1911 = vperm.xlu1 %2167, %v1908_v3   ;;  %v1075_v3 = vrot.slane %v2344_v2, %v2603_v33  ;;  %v1079_v43 = vrot.slane %v2344_v2, %v1078_v31 }
  0xeb   : > { %v860_v47 = vmul.f32 %v855_v44, %v850_v45  ;;  %v861_v49 = vmul.f32 %v859_v15, %v850_v45  ;;  %v1027_v29 = vrot.slane %v1017_v32, %v2577_v19  ;;  %v1031_v44 = vrot.slane %v1021_v34, %v2577_v19 }
  0xec   : > { %v843_v50 = vadd.f32 %v841_v17, %v727_v56  ;;  %v844_v35 = vadd.f32 %v842_v46, %v728_v62  ;;  %v912_v15 = vrot.slane %v2861_v40, %v2572_v18  ;;  %v916_v6 = vrot.slane %v2865_v41, %v2572_v18 }
  0xed   : > { %v869_v59 = vpop.permute.xlu1 %868 }
  0xee   : > { %v888_v4 = vpop.permute.xlu0 %887  ;;  %v862_v9 = vadd.f32 %v860_v47, %v843_v50  ;;  %v863_v11 = vadd.f32 %v861_v49, %v844_v35  ;;  %v879_v12 = vmul.f32 %v874_v52, %v869_v59  ;;  %v880_v13 = vmul.f32 %v878_v58, %v869_v59 }
  0xef   : > { %v898_v16 = vmul.f32 %v893_v61, %v888_v4  ;;  %v899_v21 = vmul.f32 %v897_v63, %v888_v4  ;;  %v1056_v49 = vrot.slane %v1046_v42, %v2600_v30  ;;  %v1060_v50 = vrot.slane %v1050_v28, %v2600_v30 }
  0xf0   : > { %v881_v56 = vadd.f32 %v879_v12, %v862_v9  ;;  %v882_v62 = vadd.f32 %v880_v13, %v863_v11  ;;  %v1085_v52 = vrot.slane %v1075_v3, %v2603_v33  ;;  %v1089_v58 = vrot.slane %v1079_v43, %v2603_v33 }
  0xf1   : > { %v907_v22 = vpop.permute.xlu1 %906  ;;  %v1104_v12 = vrot.slane %v2342_v1, %v2572_v18  ;;  %v1108_v13 = vrot.slane %v2342_v1, %v991_v8  ;;  %v950_v8 = vrot.slane %v2861_v40, %v2600_v30 }
  0xf2   : > { %v926_v60 = vpop.permute.xlu0 %925  ;;  %v900_v26 = vadd.f32 %v898_v16, %v881_v56  ;;  %v901_v5 = vadd.f32 %v899_v21, %v882_v62  ;;  %v917_v35 = vmul.f32 %v912_v15, %v907_v22  ;;  %v918_v2 = vmul.f32 %v916_v6, %v907_v22 }
  0xf3   : > { %v936_v34 = vmul.f32 %v931_v23, %v926_v60  ;;  %v1118_v15 = vrot.slane %v1108_v13, %v2572_v18 }
  0xf4   : > { %v919_v22 = vadd.f32 %v917_v35, %v2806_v24  ;;  %v920_v14 = vadd.f32 %v918_v2, %v2808_v36  ;;  %v954_v24 = vrot.slane %v2865_v41, %v2600_v30 }
  0xf5   : > { %v945_v37 = vpop.permute.xlu1 %944 }
  0xf6   : > { %v2855_v25 = vpop.permute.xlu0 %963  ;;  %v938_v28 = vadd.f32 %v936_v34, %v919_v22  ;;  %v955_v43 = vmul.f32 %v950_v8, %v945_v37 }
  0xf9   : > { %v983_v45 = vpop.permute.xlu1 %982 }
  0xfa   : > { %v1012_v17 = vpop.permute.xlu0 %1011  ;;  %v1003_v46 = vmul.f32 %v998_v38, %v983_v45  ;;  %v1004_v47 = vmul.f32 %v1002_v39, %v983_v45  ;;  %v2905_v45 = vld [vmem:[%s2336_s9] sm:$0xff]  ;;  %s230_s9 = sand.u32 1, %s2233_s19  }
  0xfb   : > { %v1032_v63 = vmul.f32 %v1027_v29, %v1012_v17  ;;  %v1033_v4 = vmul.f32 %v1031_v44, %v1012_v17  ;;  %v956_v29 = vmul.f32 %v954_v24, %v945_v37  ;;  %v1114_v44 = vrot.slane %v1104_v12, %v2572_v18  ;;  %s2035_s26 = sshll.u32 %s230_s9, 3  ;;  %s1946_s12 = scalar_lea.sflag [#allocation3], %s230_s9 }
  0xfc   : > { %v1005_v59 = vadd.f32 %v1003_v46, %v900_v26  ;;  %v1006_v61 = vadd.f32 %v1004_v47, %v901_v5  ;;  %v935_v26 = vrot.slane %v2865_v41, %v2577_v19  ;;  %v1133_v17 = vrot.slane %v2905_v45, %v2577_v19  ;;  %s232_s7 = scalar_lea.vmem [#allocation2], %s2035_s26 }
  0xfd   : > { %v1041_v9 = vpop.permute.xlu1 %1040  ;;  %v1137_v46 = vrot.slane %v2905_v45, %v1020_v20  ;;  %v957_v47 = vadd.f32 %v955_v43, %v938_v28  ;;  %s1960_s8 = sshll.u32 %s232_s7, 4  ;;  %s3102_s8 = int_to_ptr.vmem [resolvable:$true] %s1960_s8 }
  0xfe   : > { %v1070_v11 = vpop.permute.xlu0 %1069  ;;  %v1034_v16 = vadd.f32 %v1032_v63, %v1005_v59  ;;  %v1035_v21 = vadd.f32 %v1033_v4, %v1006_v61  ;;  %v1061_v56 = vmul.f32 %v1056_v49, %v1041_v9  ;;  %v1062_v62 = vmul.f32 %v1060_v50, %v1041_v9  ;;  %s2179_s14 = scalar_lea.vmem %s3102_s8, 128  ;;  %p2186_p0 = scmp.lt.s32.totalorder %s3102_s8, %s2184_s15 }
  0xff   : > { %v1090_v27 = vmul.f32 %v1085_v52, %v1070_v11  ;;  %v1091_v32 = vmul.f32 %v1089_v58, %v1070_v11  ;;  %v937_v1 = vmul.f32 %v935_v26, %v926_v60  ;;  %v969_v49 = vrot.slane %v2861_v40, %v2603_v33  ;;  %p2180_p11 = scmp.ne.s32.totalorder %s3102_s8, %s2179_s14  ;;  %p2187_p1 = scmp.lt.s32.totalorder %s2185_s16, %s2179_s14 }
 0x100   : > { %v1063_v5 = vadd.f32 %v1061_v56, %v1034_v16  ;;  %v1064_v55 = vadd.f32 %v1062_v62, %v1035_v21  ;;  %v973_v50 = vrot.slane %v2865_v41, %v2603_v33  ;;  %v1143_v20 = vrot.slane %v1133_v17, %v2577_v19 }
 0x101   : > { %v1099_v36 = vpop.permute.xlu1 %1098  ;;  %v939_v3 = vadd.f32 %v937_v1, %v920_v14  ;;  %v974_v35 = vmul.f32 %v969_v49, %v2855_v25  ;;  %v1147_v63 = vrot.slane %v1137_v46, %v2577_v19  ;;  %v1162_v11 = vrot.slane %v2905_v45, %v2600_v30  ;;  %p2181_p12 = pnand %p2180_p11, %p2321_p5  ;;  %p2188_p2 = por %p2187_p1, %p2186_p0 }
 0x102   : > { %v1128_v38 = vpop.permute.xlu0 %1127  ;;  %v1092_v39 = vadd.f32 %v1090_v27, %v1063_v5  ;;  %v1093_v42 = vadd.f32 %v1091_v32, %v1064_v55  ;;  %v975_v2 = vmul.f32 %v973_v50, %v2855_v25  ;;  %v1119_v52 = vmul.f32 %v1114_v44, %v1099_v36 }
 0x103   : > { %v958_v37 = vadd.f32 %v956_v29, %v939_v3  ;;  %v1120_v58 = vmul.f32 %v1118_v15, %v1099_v36  ;;  %v976_v9 = vadd.f32 %v974_v35, %v957_v47  ;;  %v1166_v25 = vrot.slane %v2905_v45, %v1049_v54  ;;  %p2182_p13 = pneg %p2181_p12 }
 0x104   : > { %v1148_v22 = vmul.f32 %v1143_v20, %v1128_v38  ;;  %v1149_v14 = vmul.f32 %v1147_v63, %v1128_v38  ;;  %v1172_v23 = vrot.slane %v1162_v11, %v2600_v30  ;;  %v1191_v5 = vrot.slane %v2905_v45, %v2603_v33 }
 0x105   : > { %v1157_v6 = vpop.permute.xlu1 %1156  ;;  %v977_v41 = vadd.f32 %v975_v2, %v958_v37  ;;  %v1121_v12 = vadd.f32 %v1119_v52, %v976_v9  ;;  %v1176_v26 = vrot.slane %v1166_v25, %v2600_v30  ;;  %v1195_v54 = vrot.slane %v2905_v45, %v1078_v31  ;;  %p2189_p3 = pnand %p2188_p2, %p2182_p13 }
 0x106   : > { %v2902_v60 = vpop.permute.xlu0 %1185  ;;  %v1177_v3 = vmul.f32 %v1172_v23, %v1157_v6 }
 0x107   : > { %v1122_v13 = vadd.f32 %v1120_v58, %v977_v41  ;;  %v1150_v32 = vadd.f32 %v1148_v22, %v1121_v12  ;;  %v1178_v43 = vmul.f32 %v1176_v26, %v1157_v6 }
 0x109   : > { %v1211_v59 = vpop.permute.xlu1 %1210  ;;  %v1151_v34 = vadd.f32 %v1149_v14, %v1122_v13 }
 0x10a   : > { %v1213_v61 = vpop.permute.xlu0 %1212 }
 0x10b   : > { %v1215_v4 = vsel %vm1214_vm11, %v1211_v59, %v1213_v61  ;;  %v1216_v40 = vsel %vm1214_vm11, %v1213_v61, %v1211_v59  ;;  %v1180_v9 = vadd.f32 %v1178_v43, %v1151_v34 }
 0x10c   : > { %v1227_v16 = vsel %vm2715_vm7, %v1215_v4, 0.0  ;;  %v1228_v21 = vsel %vm2721_vm8, %v1216_v40, 0.0  ;;  %v1179_v40 = vadd.f32 %v1177_v3, %v1150_v32 }
 0x10d   : > { %v1218_v56 = vpop.permute.xlu1 %1217  ;;  %v1241_v55 = vrot.slane %v1227_v16, %v2572_v18  ;;  %v1245_v27 = vrot.slane %v1228_v21, %v2572_v18  ;;  %v1260_v8 = vrot.slane %v1227_v16, %v2577_v19  ;;  %v1264_v24 = vrot.slane %v1228_v21, %v2577_v19 }
 0x10e   : > { %v1220_v62 = vpop.permute.xlu0 %1219  ;;  %v1279_v29 = vrot.slane %v1227_v16, %v2600_v30  ;;  %v1283_v44 = vrot.slane %v1228_v21, %v2600_v30  ;;  %v1298_v50 = vrot.slane %v1227_v16, %v2603_v33  ;;  %v1302_v35 = vrot.slane %v1228_v21, %v2603_v33 }
 0x10f   : > { %v1221_v38 = vsel %vm1214_vm11, %v1218_v56, %v1220_v62  ;;  %v1222_v7 = vsel %vm1214_vm11, %v1220_v62, %v1218_v56 }
 0x110   : > { %v1229_v47 = vsel %vm2715_vm7, %v1221_v38, 0.0  ;;  %v1230_v37 = vsel %vm2721_vm8, %v1222_v7, 0.0 }
 0x111   : > { %v1236_v1 = vpop.permute.xlu1 %1235  ;;  %v1317_v11 = vrot.slane %v1229_v47, %v2572_v18  ;;  %v1321_v25 = vrot.slane %v1230_v37, %v2572_v18  ;;  %v1340_v32 = vrot.slane %v1230_v37, %v2577_v19 }
 0x112   : > { %v1255_v36 = vpop.permute.xlu0 %1254  ;;  %v1246_v28 = vmul.f32 %v1241_v55, %v1236_v1  ;;  %v1247_v31 = vmul.f32 %v1245_v27, %v1236_v1  ;;  %v1336_v27 = vrot.slane %v1229_v47, %v2577_v19 }
 0x113   : > { %v1265_v17 = vmul.f32 %v1260_v8, %v1255_v36  ;;  %v1266_v46 = vmul.f32 %v1264_v24, %v1255_v36  ;;  %v1355_v8 = vrot.slane %v1229_v47, %v2600_v30  ;;  %v1359_v24 = vrot.slane %v1230_v37, %v2600_v30 }
 0x114   : > { %v1248_v15 = vadd.f32 %v1246_v28, %v1092_v39  ;;  %v1249_v45 = vadd.f32 %v1247_v31, %v1093_v42  ;;  %v1201_v39 = vrot.slane %v1191_v5, %v2603_v33  ;;  %v1205_v42 = vrot.slane %v1195_v54, %v2603_v33 }
 0x115   : > { %v1274_v49 = vpop.permute.xlu1 %1273 }
 0x116   : > { %v1293_v6 = vpop.permute.xlu0 %1292  ;;  %v1267_v2 = vadd.f32 %v1265_v17, %v1248_v15  ;;  %v1268_v52 = vadd.f32 %v1266_v46, %v1249_v45  ;;  %v1284_v58 = vmul.f32 %v1279_v29, %v1274_v49  ;;  %v1285_v59 = vmul.f32 %v1283_v44, %v1274_v49 }
 0x117   : > { %v1303_v63 = vmul.f32 %v1298_v50, %v1293_v6  ;;  %v1304_v4 = vmul.f32 %v1302_v35, %v1293_v6  ;;  %v1206_v21 = vmul.f32 %v1201_v39, %v2902_v60  ;;  %v1207_v56 = vmul.f32 %v1205_v42, %v2902_v60 }
 0x118   : > { %v1286_v61 = vadd.f32 %v1284_v58, %v1267_v2  ;;  %v1287_v20 = vadd.f32 %v1285_v59, %v1268_v52  ;;  %v1374_v29 = vrot.slane %v1229_v47, %v2603_v33  ;;  %v1378_v44 = vrot.slane %v1230_v37, %v2603_v33 }
 0x119   : > { %v1312_v41 = vpop.permute.xlu1 %1311  ;;  %v1208_v14 = vadd.f32 %v1206_v21, %v1179_v40  ;;  %v1209_v23 = vadd.f32 %v1207_v56, %v1180_v9 }
 0x11a   : > { %v1331_v12 = vpop.permute.xlu0 %1330  ;;  %v2961_v13 = vadd.f32 %v1303_v63, %v1286_v61  ;;  %v2963_v16 = vadd.f32 %v1304_v4, %v1287_v20  ;;  %v1322_v62 = vmul.f32 %v1317_v11, %v1312_v41  ;;  %v1323_v22 = vmul.f32 %v1321_v25, %v1312_v41 }
 0x11b   : > { %v1341_v34 = vmul.f32 %v1336_v27, %v1331_v12  ;;  %v1342_v1 = vmul.f32 %v1340_v32, %v1331_v12 }
 0x11c   : > { %v1324_v54 = vadd.f32 %v1322_v62, %v1208_v14  ;;  %v1325_v55 = vadd.f32 %v1323_v22, %v1209_v23 }
 0x11d   : > { %v1350_v26 = vpop.permute.xlu1 %1349 }
 0x11e   : > { %v1369_v5 = vpop.permute.xlu0 %1368  ;;  %v1343_v38 = vadd.f32 %v1341_v34, %v1324_v54  ;;  %v1344_v7 = vadd.f32 %v1342_v1, %v1325_v55  ;;  %v1360_v28 = vmul.f32 %v1355_v8, %v1350_v26  ;;  %v1361_v31 = vmul.f32 %v1359_v24, %v1350_v26 }
 0x11f   : > { %v1379_v10 = vmul.f32 %v1374_v29, %v1369_v5  ;;  %v1380_v50 = vmul.f32 %v1378_v44, %v1369_v5 }
 0x120   : > { %v1362_v45 = vadd.f32 %v1360_v28, %v1343_v38  ;;  %v1363_v17 = vadd.f32 %v1361_v31, %v1344_v7 }
 0x121   : > { %v1489_v36 = vpop.permute.xlu1 %1488 }
 0x122   : > { %v1508_v60 = vpop.permute.xlu0 %1507  ;;  %v1381_v39 = vadd.f32 %v1379_v10, %v1362_v45  ;;  %v1382_v42 = vadd.f32 %v1380_v50, %v1363_v17 }
 0x125   : > { %v1391_v3 = vpop.permute.xlu1 %1390 }
 0x126   : > { %v1393_v15 = vpop.permute.xlu0 %1392 }
 0x127   : > { %v1394_v46 = vsel %vm1387_vm13, %v1391_v3, %v1393_v15  ;;  %v1395_v49 = vsel %vm1387_vm13, %v1393_v15, %v1391_v3 }
 0x128   : > { %v1406_v35 = vsel %vm2537_vm2, %v1394_v46, 0.0  ;;  %v1407_v6 = vsel %vm2977_vm14, %v1395_v49, 0.0 }
 0x129   : > { %v1494_v47 = vrot.slane %v1406_v35, %v2572_v18  ;;  %v1498_v37 = vrot.slane %v1407_v6, %v2572_v18  ;;  %v1513_v2 = vrot.slane %v1406_v35, %v2577_v19  ;;  %v1517_v52 = vrot.slane %v1407_v6, %v2577_v19  ;;  %v1527_v58 = vpop.permute.xlu1 %1526 }
 0x12a   : > { %v1546_v59 = vpop.permute.xlu0 %1545  ;;  %v1532_v63 = vrot.slane %v1406_v35, %v2600_v30  ;;  %v1536_v4 = vrot.slane %v1407_v6, %v2600_v30  ;;  %v1551_v22 = vrot.slane %v1406_v35, %v2603_v33  ;;  %v1555_v23 = vrot.slane %v1407_v6, %v2603_v33 }
 0x12b   : > { %v1499_v61 = vmul.f32 %v1494_v47, %v1489_v36  ;;  %v1500_v20 = vmul.f32 %v1498_v37, %v1489_v36  ;;  %v1518_v41 = vmul.f32 %v1513_v2, %v1508_v60  ;;  %v1519_v11 = vmul.f32 %v1517_v52, %v1508_v60 }
 0x12c   : > { %v1537_v62 = vmul.f32 %v1532_v63, %v1527_v58  ;;  %v1538_v14 = vmul.f32 %v1536_v4, %v1527_v58  ;;  %v1556_v34 = vmul.f32 %v1551_v22, %v1546_v59  ;;  %v1557_v36 = vmul.f32 %v1555_v23, %v1546_v59 }
 0x12d   : > { %v1501_v40 = vadd.f32 %v1499_v61, %v1381_v39  ;;  %v1502_v9 = vadd.f32 %v1500_v20, %v1382_v42  ;;  %v1662_v25 = vpop.permute.xlu1 %1661 }
 0x12e   : > { %v1681_v12 = vpop.permute.xlu0 %1680 }
 0x12f   : > { %v1520_v21 = vadd.f32 %v1518_v41, %v1501_v40  ;;  %v1521_v56 = vadd.f32 %v1519_v11, %v1502_v9 }
 0x131   : > { %v1568_v26 = vpop.permute.xlu1 %1567  ;;  %v1539_v5 = vadd.f32 %v1537_v62, %v1520_v21  ;;  %v1540_v55 = vadd.f32 %v1538_v14, %v1521_v56 }
 0x132   : > { %v1570_v54 = vpop.permute.xlu0 %1569 }
 0x133   : > { %v1571_v27 = vsel %vm1564_vm15, %v1568_v26, %v1570_v54  ;;  %v1572_v32 = vsel %vm1564_vm15, %v1570_v54, %v1568_v26  ;;  %v1558_v28 = vadd.f32 %v1556_v34, %v1539_v5  ;;  %v1559_v29 = vadd.f32 %v1557_v36, %v1540_v55 }
 0x134   : > { %v1580_v1 = vsel %vm1397_vm12, %v1572_v32, 0.0  ;;  %v1667_v8 = vrot.slane %v1571_v27, %v2572_v18  ;;  %v1686_v24 = vrot.slane %v1571_v27, %v2577_v19  ;;  %v1705_v17 = vrot.slane %v1571_v27, %v2600_v30 }
 0x135   : > { %v1671_v60 = vrot.slane %v1580_v1, %v2572_v18  ;;  %v1690_v38 = vrot.slane %v1580_v1, %v2577_v19  ;;  %v1700_v7 = vpop.permute.xlu1 %1699  ;;  %v1709_v46 = vrot.slane %v1580_v1, %v2600_v30  ;;  %v1724_v52 = vrot.slane %v1571_v27, %v2603_v33 }
 0x136   : > { %v1672_v31 = vmul.f32 %v1667_v8, %v1662_v25  ;;  %v1719_v3 = vpop.permute.xlu0 %1718  ;;  %v1691_v45 = vmul.f32 %v1686_v24, %v1681_v12  ;;  %v1710_v37 = vmul.f32 %v1705_v17, %v1700_v7  ;;  %v1728_v58 = vrot.slane %v1580_v1, %v2603_v33 }
 0x137   : > { %v1673_v44 = vmul.f32 %v1671_v60, %v1662_v25  ;;  %v1692_v10 = vmul.f32 %v1690_v38, %v1681_v12  ;;  %v1711_v2 = vmul.f32 %v1709_v46, %v1700_v7  ;;  %v1729_v40 = vmul.f32 %v1724_v52, %v1719_v3 }
 0x138   : > { %v1674_v15 = vadd.f32 %v1672_v31, %v1558_v28  ;;  %v1730_v9 = vmul.f32 %v1728_v58, %v1719_v3 }
 0x139   : > { %v1675_v49 = vadd.f32 %v1673_v44, %v1559_v29  ;;  %v1837_v50 = vpop.permute.xlu1 %1836 }
 0x13a   : > { %v1693_v35 = vadd.f32 %v1691_v45, %v1674_v15  ;;  %v1856_v6 = vpop.permute.xlu0 %1855 }
 0x13b   : > { %v1694_v47 = vadd.f32 %v1692_v10, %v1675_v49 }
 0x13c   : > { %v1712_v42 = vadd.f32 %v1710_v37, %v1693_v35 }
 0x13d   : > { %v1741_v59 = vpop.permute.xlu1 %1740  ;;  %v1713_v61 = vadd.f32 %v1711_v2, %v1694_v47 }
 0x13e   : > { %v1743_v20 = vpop.permute.xlu0 %1742  ;;  %v1731_v62 = vadd.f32 %v1729_v40, %v1712_v42 }
 0x13f   : > { %v1744_v63 = vsel %vm1737_vm0, %v1741_v59, %v1743_v20  ;;  %v1745_v4 = vsel %vm1737_vm0, %v1743_v20, %v1741_v59  ;;  %v1732_v22 = vadd.f32 %v1730_v9, %v1713_v61 }
 0x140   : > { %v1754_v51 = vsel %vm2715_vm7, %v1744_v63, 0.0  ;;  %v1755_v41 = vsel %vm3019_vm1, %v1745_v4, 0.0 }
 0x141   : > { %v1842_v11 = vrot.slane %v1754_v51, %v2572_v18  ;;  %v1846_v25 = vrot.slane %v1755_v41, %v2572_v18  ;;  %v1861_v12 = vrot.slane %v1754_v51, %v2577_v19  ;;  %v1865_v21 = vrot.slane %v1755_v41, %v2577_v19  ;;  %v1875_v56 = vpop.permute.xlu1 %1874 }
 0x142   : > { %v1894_v14 = vpop.permute.xlu0 %1893  ;;  %v1880_v5 = vrot.slane %v1754_v51, %v2600_v30  ;;  %v1884_v54 = vrot.slane %v1755_v41, %v2600_v30  ;;  %v1899_v55 = vrot.slane %v1754_v51, %v2603_v33  ;;  %v1903_v27 = vrot.slane %v1755_v41, %v2603_v33 }
 0x143   : > { %v1847_v23 = vmul.f32 %v1842_v11, %v1837_v50  ;;  %v1848_v26 = vmul.f32 %v1846_v25, %v1837_v50  ;;  %v1866_v1 = vmul.f32 %v1861_v12, %v1856_v6  ;;  %v1867_v8 = vmul.f32 %v1865_v21, %v1856_v6 }
 0x144   : > { %v1885_v7 = vmul.f32 %v1880_v5, %v1875_v56  ;;  %v1886_v28 = vmul.f32 %v1884_v54, %v1875_v56  ;;  %v1904_v29 = vmul.f32 %v1899_v55, %v1894_v14  ;;  %v1905_v44 = vmul.f32 %v1903_v27, %v1894_v14 }
 0x145   : > { %v1849_v32 = vadd.f32 %v1847_v23, %v1731_v62  ;;  %v1850_v34 = vadd.f32 %v1848_v26, %v1732_v22  ;;  %v1413_v24 = vpop.permute.xlu1 %1412 }
 0x146   : > { %v1432_v36 = vpop.permute.xlu0 %1431 }
 0x147   : > { %v1868_v60 = vadd.f32 %v1866_v1, %v1849_v32  ;;  %v1869_v38 = vadd.f32 %v1867_v8, %v1850_v34 }
 0x149   : > { %v1887_v31 = vadd.f32 %v1885_v7, %v1868_v60  ;;  %v1888_v3 = vadd.f32 %v1886_v28, %v1869_v38  ;;  %v1384_v15 = vpop.permute.xlu1 %1383 }
 0x14a   : > { %v1386_v45 = vpop.permute.xlu0 %1385 }
 0x14b   : > { %v1906_v17 = vadd.f32 %v1904_v29, %v1887_v31  ;;  %v1907_v46 = vadd.f32 %v1905_v44, %v1888_v3  ;;  %v1388_v49 = vsel %vm1387_vm13, %v1384_v15, %v1386_v45  ;;  %v1389_v10 = vsel %vm1387_vm13, %v1386_v45, %v1384_v15 }
 0x14c   : > { %v1404_v50 = vsel %vm2537_vm2, %v1388_v49, 0.0  ;;  %v1405_v35 = vsel %vm2977_vm14, %v1389_v10, 0.0 }
 0x14d   : > { %v1418_v6 = vrot.slane %v1404_v50, %v2572_v18  ;;  %v1422_v47 = vrot.slane %v1405_v35, %v2572_v18  ;;  %v1437_v37 = vrot.slane %v1404_v50, %v2577_v19  ;;  %v1451_v2 = vpop.permute.xlu1 %1450  ;;  %2170 = vtanh.f32 %v1906_v17 }
 0x14e   : > { %v1441_v52 = vrot.slane %v1405_v35, %v2577_v19  ;;  %v1470_v58 = vpop.permute.xlu0 %1469  ;;  %2172 = vtanh.f32 %v1907_v46  ;;  %v1456_v0 = vrot.slane %v1404_v50, %v2600_v30  ;;  %v1460_v61 = vrot.slane %v1405_v35, %v2600_v30 }
 0x14f   : > { %v1423_v59 = vmul.f32 %v1418_v6, %v1413_v24  ;;  %v1424_v42 = vmul.f32 %v1422_v47, %v1413_v24  ;;  %v1442_v63 = vmul.f32 %v1437_v37, %v1432_v36  ;;  %v1475_v25 = vrot.slane %v1404_v50, %v2603_v33 }
 0x150   : > { %v1443_v4 = vmul.f32 %v1441_v52, %v1432_v36  ;;  %v1461_v11 = vmul.f32 %v1456_v0, %v1451_v2  ;;  %v1462_v12 = vmul.f32 %v1460_v61, %v1451_v2  ;;  %v1479_v21 = vrot.slane %v1405_v35, %v2603_v33 }
 0x151   : > { %v1425_v43 = vadd.f32 %v1423_v59, %v2961_v13  ;;  %v1426_v20 = vadd.f32 %v1424_v42, %v2963_v16  ;;  %v1586_v40 = vpop.permute.xlu1 %1585  ;;  %v1480_v26 = vmul.f32 %v1475_v25, %v1470_v58 }
 0x152   : > { %v1605_v9 = vpop.permute.xlu0 %1604  ;;  %v1481_v32 = vmul.f32 %v1479_v21, %v1470_v58 }
 0x153   : > { %v1444_v51 = vadd.f32 %v1442_v63, %v1425_v43  ;;  %v1445_v41 = vadd.f32 %v1443_v4, %v1426_v20 }
 0x155   : > { %v1561_v56 = vpop.permute.xlu1 %1560  ;;  %v1463_v62 = vadd.f32 %v1461_v11, %v1444_v51  ;;  %v1464_v14 = vadd.f32 %v1462_v12, %v1445_v41 }
 0x156   : > { %v1563_v22 = vpop.permute.xlu0 %1562 }
 0x157   : > { %v1565_v13 = vsel %vm1564_vm15, %v1561_v56, %v1563_v22  ;;  %v1566_v16 = vsel %vm1564_vm15, %v1563_v22, %v1561_v56  ;;  %v2171_v23 = vpop.eup %2170  ;;  %v1482_v24 = vadd.f32 %v1480_v26, %v1463_v62  ;;  %v1483_v38 = vadd.f32 %v1481_v32, %v1464_v14 }
 0x158   : > { %v1578_v5 = vsel %vm1397_vm12, %v1566_v16, 0.0  ;;  %v1591_v54 = vrot.slane %v1565_v13, %v2572_v18  ;;  %v1610_v55 = vrot.slane %v1565_v13, %v2577_v19  ;;  %v2173_v27 = vpop.eup %2172  ;;  %v1629_v28 = vrot.slane %v1565_v13, %v2600_v30 }
 0x159   : > { %v1595_v34 = vrot.slane %v1578_v5, %v2572_v18  ;;  %v1614_v1 = vrot.slane %v1578_v5, %v2577_v19  ;;  %v1624_v8 = vpop.permute.xlu1 %1623  ;;  %v3068_v3 = vadd.f32 1.01, %v2171_v23  ;;  %v3070_v29 = vadd.f32 1.01, %v2173_v27 }
 0x15a   : > { %v1596_v36 = vmul.f32 %v1591_v54, %v1586_v40  ;;  %v1643_v60 = vpop.permute.xlu0 %1642  ;;  %v1615_v31 = vmul.f32 %v1610_v55, %v1605_v9  ;;  %v1633_v45 = vrot.slane %v1578_v5, %v2600_v30  ;;  %v1634_v50 = vmul.f32 %v1629_v28, %v1624_v8 }
 0x15b   : > { %v1597_v7 = vmul.f32 %v1595_v34, %v1586_v40  ;;  %v1616_v15 = vmul.f32 %v1614_v1, %v1605_v9  ;;  %2174 = vlog2.f32 %v3068_v3  ;;  %v1648_v35 = vrot.slane %v1565_v13, %v2603_v33 }
 0x15c   : > { %v1598_v57 = vadd.f32 %v1596_v36, %v1482_v24  ;;  %2176 = vlog2.f32 %v3070_v29  ;;  %v1652_v6 = vrot.slane %v1578_v5, %v2603_v33  ;;  %v1635_v47 = vmul.f32 %v1633_v45, %v1624_v8 }
 0x15d   : > { %v1599_v44 = vadd.f32 %v1597_v7, %v1483_v38  ;;  %v1761_v17 = vpop.permute.xlu1 %1760  ;;  %v1653_v0 = vmul.f32 %v1648_v35, %v1643_v60 }
 0x15e   : > { %v1617_v46 = vadd.f32 %v1615_v31, %v1598_v57  ;;  %v1780_v49 = vpop.permute.xlu0 %1779  ;;  %v1654_v61 = vmul.f32 %v1652_v6, %v1643_v60 }
 0x15f   : > { %v1618_v10 = vadd.f32 %v1616_v15, %v1599_v44 }
 0x160   : > { %v1636_v2 = vadd.f32 %v1634_v50, %v1617_v46 }
 0x161   : > { %v1734_v37 = vpop.permute.xlu1 %1733  ;;  %v1637_v58 = vadd.f32 %v1635_v47, %v1618_v10 }
 0x162   : > { %v1736_v52 = vpop.permute.xlu0 %1735  ;;  %v1655_v51 = vadd.f32 %v1653_v0, %v1636_v2 }
 0x163   : > { %v1738_v59 = vsel %vm1737_vm0, %v1734_v37, %v1736_v52  ;;  %v1739_v42 = vsel %vm1737_vm0, %v1736_v52, %v1734_v37  ;;  %v1656_v41 = vadd.f32 %v1654_v61, %v1637_v58 }
 0x164   : > { %v1752_v43 = vsel %vm2715_vm7, %v1738_v59, 0.0  ;;  %v1753_v20 = vsel %vm3019_vm1, %v1739_v42, 0.0 }
 0x165   : > { %v1766_v63 = vrot.slane %v1752_v43, %v2572_v18  ;;  %v1770_v4 = vrot.slane %v1753_v20, %v2572_v18  ;;  %v1785_v40 = vrot.slane %v1752_v43, %v2577_v19  ;;  %v1789_v9 = vrot.slane %v1753_v20, %v2577_v19  ;;  %v1799_v12 = vpop.permute.xlu1 %1798  ;;  %v2175_v21 = vpop.eup %2174 }
 0x166   : > { %v1804_v53 = vrot.slane %v1752_v43, %v2600_v30  ;;  %v1808_v48 = vrot.slane %v1753_v20, %v2600_v30  ;;  %v1823_v56 = vrot.slane %v1752_v43, %v2603_v33  ;;  %v1827_v62 = vrot.slane %v1753_v20, %v2603_v33  ;;  %v2177_v18 = vpop.eup %2176  ;;  %v1818_v19 = vpop.permute.xlu0 %1817 }
 0x167   : > { %v1771_v11 = vmul.f32 %v1766_v63, %v1761_v17  ;;  %v1772_v25 = vmul.f32 %v1770_v4, %v1761_v17  ;;  %v1790_v39 = vmul.f32 %v1785_v40, %v1780_v49  ;;  %v1791_v13 = vmul.f32 %v1789_v9, %v1780_v49 }
 0x168   : > { %v1923_v16 = vmul.f32 0.6931472, %v2175_v21  ;;  %v1809_v23 = vmul.f32 %v1804_v53, %v1799_v12  ;;  %v1925_v26 = vmul.f32 0.6931472, %v2177_v18  ;;  %v1810_v55 = vmul.f32 %v1808_v48, %v1799_v12 }
 0x169   : > { %v1773_v22 = vadd.f32 %v1771_v11, %v1655_v51  ;;  %v1774_v14 = vadd.f32 %v1772_v25, %v1656_v41  ;;  %v1828_v30 = vmul.f32 %v1823_v56, %v1818_v19  ;;  %v1829_v8 = vmul.f32 %v1827_v62, %v1818_v19  ;;  %v1912_v7 = vpop.permute.xlu1 %1911 }
 0x16a   : > { %v1926_v27 = vmul.f32 -0.0001, %v1923_v16  ;;  %v1927_v32 = vmul.f32 -0.0001, %v1925_v26 }
 0x16b   : > { %v1792_v5 = vadd.f32 %v1790_v39, %v1773_v22  ;;  %v1793_v54 = vadd.f32 %v1791_v13, %v1774_v14 }
 0x16c   : > { %v1928_v24 = vmul.f32 0.5, %v1926_v27  ;;  %v1929_v33 = vmul.f32 0.5, %v1927_v32 }
 0x16d   : > { %v1811_v34 = vadd.f32 %v1809_v23, %v1792_v5  ;;  %v1812_v1 = vadd.f32 %v1810_v55, %v1793_v54 }
 0x16e   : > { %v1930_v38 = vadd.f32 1.0, %v1928_v24  ;;  %v1931_v28 = vadd.f32 1.0, %v1929_v33 }
 0x16f   : > { %v1830_v36 = vadd.f32 %v1828_v30, %v1811_v34  ;;  %v1831_v60 = vadd.f32 %v1829_v8, %v1812_v1 }
 0x170   : > { %v1932_v44 = vmul.f32 %v1930_v38, %v1926_v27  ;;  %v1933_v15 = vmul.f32 %v1931_v28, %v1927_v32 }
 0x171   : > { %v1914_v57 = vadd.f32 %v1912_v7, %v1830_v36  ;;  %v1915_v31 = vadd.f32 %v1912_v7, %v1831_v60 }
 0x172   : > { %v1934_v17 = vadd.f32 1.0, %v1932_v44  ;;  %v1935_v49 = vadd.f32 1.0, %v1933_v15 }
 0x173   : > { %v1916_v45 = vmax.f32 %v1914_v57, 0.0  ;;  %v1917_v46 = vmax.f32 %v1915_v31, 0.0 }
 0x174   : > { %v1936_v10 = vmul.f32 %v1934_v17, %v3068_v3  ;;  %v1937_v50 = vmul.f32 %v1935_v49, %v3070_v29 }
 0x176   : > { %v1938_v35 = vadd.f32 %v1936_v10, %v1916_v45  ;;  %v1939_v6 = vadd.f32 %v1937_v50, %v1917_v46 }
 0x178   : > { %v1942_v47 = vcombine.low %v1938_v35, %v1939_v6 }
 0x17a   : > { %1944 = vst [vmem:[%s232_s7] sm:$0xff] %v1942_v47 }
 0x17b   : > { %2192 = shalt.err (!%p2189_p3)
}
 0x17c   : > { %s2193_s13 = scalar_lea.hbm %s3100_s11, 128  ;;  %s2197_s17 = scalar_lea.hbm %s3147_s5, 256 }
 0x17d   : > { %p2194_p4 = scmp.ne.s32.totalorder %s3100_s11, %s2193_s13  ;;  %p2198_p9 = scmp.lt.u32.totalorder %s3100_s11, %s3147_s5 }
 0x17e   : > { %p2199_p10 = scmp.lt.u32.totalorder %s2197_s17, %s2193_s13  ;;  %p2201_p12 = scmp.lt.u32.totalorder %s2193_s13, %s3100_s11 }
 0x17f   : > { %p2195_p7 = pnand %p2194_p4, %p2321_p5 }
 0x180   : > { %p2200_p11 = por %p2199_p10, %p2198_p9 }
 0x181   : > { %p2196_p8 = pneg %p2195_p7 }
 0x182   : > { %p2202_p13 = por %p2201_p12, %p2200_p11 }
 0x184   : > { %p2203_p0 = pnand %p2202_p13, %p2196_p8 }
 0x186   : > { %2206 = shalt.err (!%p2203_p0)
}
 0x187   : > { %2118 = dma.vmem_to_hbm [thread:$0]  (%p2321_p5), %s3102_s8, 128, %s3100_s11, %s1946_s12  }
 0x188 PF: > { %p2124_p1 = scmp.ge.s32.totalorder %s2241_s21, 2  ;;  %s1972_s30 = sand.u32 1, %s2229_s18  }
 0x189   : > { %s1973_s7 = scalar_lea.sflag [#allocation3], %s1972_s30 }
 0x18a   : > { %p2121_p2 = pnand %p2124_p1, %p2325_p6 }
 0x18c   : > { %2224 = dma.done.wait (!%p2121_p2), %s1973_s7, 128  }
 0x18d   : > { %2226 = vsyncadd (!%p2121_p2), %s1973_s7, 4294967168  ;;  %p15_p3 = scmp.ge.s32.totalorder %s2308_s24, 4   ;;  %s3166_s18 = smov %s2233_s19 }
 0x18e   : > { %s3167_s19 = smov %s2237_s20  ;;  %s3168_s20 = smov %s2319_s27 }
 0x18f   : > { %s3169_s21 = smov %s2308_s24  ;;  %17 = sbr.rel (!%p15_p3) target bundleno = 3 (0x3), region = 148 }
 0x196   :  { %1978 = vsyncpa [#allocation3], 1 }
 0x197   :  { %1980 = vsyncpa [#allocation3 + $0x1], 1 }

</bundles_post_ra>
